<compile_context>
chip_gen: v5e
topology: v5e:2x2
jax: 0.10.0
libtpu: 0.0.40
codegen_flags: <defaults>
</compile_context>

<pallas_src>
import jax
import jax.numpy as jnp
from jax.experimental import pallas as pl
from jax.experimental.pallas import tpu as pltpu


# Classes at or below this count use the unrolled VPU select gather; above it we
# fall back to the (exact) one-hot MXU matmul.
_SELECT_GATHER_MAX_CLASSES = 64


def _center_loss_kernel(labels_ref, x_ref, centers_ref, out_ref):
    labels = labels_ref[...]                            # (TB, 1) int32
    x = x_ref[...].astype(jnp.float32)                  # (TB, F)
    centers = centers_ref[...].astype(jnp.float32)      # (C, F), VMEM-resident

    tb, f = x.shape
    c = centers.shape[0]

    if c <= _SELECT_GATHER_MAX_CLASSES:
        # VPU gather: unrolled select-accumulate over classes.  Exact in f32,
        # no MXU, no precision flags.  Padded rows of a partial last tile hold
        # garbage labels but are never used as indices, so this is always safe.
        center = jnp.zeros_like(x)
        for cls in range(c):
            row = centers[cls:cls + 1, :]               # (1, F) static slice
            center = jnp.where(labels == cls, row, center)
    else:
        # Large-C fallback: one-hot @ centers on the MXU.  HIGHEST keeps the f32
        # gather exact (DEFAULT would bf16-quantize the centers).
        # TODO(synk): for very large C, replace with a scalar-prefetch DMA gather
        # keeping centers in HBM (memory_space=pl.ANY) instead of a resident block.
        class_ids = jax.lax.broadcasted_iota(jnp.int32, (tb, c), dimension=1)
        one_hot = (labels == class_ids).astype(jnp.float32)
        center = jnp.dot(
            one_hot,
            centers,
            preferred_element_type=jnp.float32,
            precision=jax.lax.Precision.HIGHEST,
        )

    dist = (x - center) ** 2
    dist = jnp.clip(dist, 1e-12, 1e12)
    loss = jnp.mean(dist, axis=-1)                      # (TB,)
    # Lane-dense store: one (1, TB) row -> unmasked vector stores instead of
    # TB/8 masked single-lane stores per grid step.
    out_ref[...] = jnp.reshape(loss, (1, tb)).astype(out_ref.dtype)


def _round_up(v, m):
    return (v + m - 1) // m * m


def _vmem_budget_bytes():
    """Generation-aware working-set budget: ~half of physical VMEM, capped at
    48 MiB (v5e/v6e: 128 MiB -> 48 MiB; v7x: 64 MiB -> 32 MiB). Conservative
    20 MiB fallback if the query is unavailable."""
    default = 20 * 1024 * 1024
    try:
        info = pltpu.get_tpu_info()
        cap = getattr(info, "vmem_capacity_bytes", None)
        if cap:
            return max(default, min(int(cap) // 2, 48 * 1024 * 1024))
    except Exception:
        pass
    return default


def _pick_batch_tile(b, f, c, *, budget, centers_buffers):
    """Largest 128-multiple batch tile whose layout-padded, double-buffered
    working set (x + labels + out tiles) plus the resident centers block fits
    the budget.  128-multiples keep the lane-dense (1, TB) out block legal and
    MXU/lane friendly."""
    f_pad = _round_up(f, 128)
    resident = centers_buffers * _round_up(c, 8) * f_pad * 4
    per_row = (
        2 * f_pad * 4        # x tile, double-buffered, lanes padded to 128
        + 2 * 128 * 4        # (TB, 1) label tile occupies a full 128-lane tile
        + 2 * 8 * 4          # (1, TB) out tile padded to 8 sublanes
    )
    avail = max(budget - resident, 0)
    tb = avail // per_row
    tb = max(128, (tb // 128) * 128)
    tb = min(tb, 2048)
    tb = min(tb, _round_up(max(b, 1), 128))   # tiny batches -> one 128-row tile
    return tb


def center_loss(x, centers, labels=None, *, batch_tile=None):
    """Pallas CenterLoss forward.

    x: (B, F) float array, centers: (C, F) float array,
    labels: (B,) int array or None (-> zeros, matching the PyTorch default).
    Returns per-sample loss of shape (B,), float32.
    """
    b, f = x.shape
    c, f2 = centers.shape
    assert f == f2, (x.shape, centers.shape)
    if labels is None:
        labels = jnp.zeros((b,), dtype=jnp.int32)
    labels2d = labels.astype(jnp.int32).reshape(b, 1)

    f_pad = _round_up(f, 128)
    centers_bytes = _round_up(c, 8) * f_pad * 4

    # Single-buffer the resident centers block when it is production-sized
    # (>= 1 MiB); the constant index_map means it is never re-fetched, so one
    # buffer suffices and frees C*F*4 bytes for larger batch tiles (v7x VMEM).
    single_buffer_centers = centers_bytes >= (1 << 20) and hasattr(pl, "Buffered")
    centers_buffers = 1 if single_buffer_centers else 2

    budget = _vmem_budget_bytes()
    tb = batch_tile if batch_tile is not None else _pick_batch_tile(
        b, f, c, budget=budget, centers_buffers=centers_buffers)
    assert tb % 128 == 0, tb   # lane-dense (1, TB) out block needs a 128-multiple
    grid = (pl.cdiv(b, tb),)

    # Layout-aware scoped-VMEM limit (v5e default is only 16 MiB).
    working = (
        centers_buffers * centers_bytes
        + 2 * tb * f_pad * 4        # double-buffered x tiles
        + 2 * tb * 128 * 4          # (tb, 1) label tiles padded to 128 lanes
        + 2 * 8 * tb * 4            # (1, tb) out tiles padded to 8 sublanes
        + (2 << 20)                 # slack
    )
    vmem_limit = int(min(max(32 * 1024 * 1024, working), 100 * 1024 * 1024))

    # CostEstimate matching the chosen gather path (advisory for XLA).
    if c <= _SELECT_GATHER_MAX_CLASSES:
        flops = b * f * (c + 5)                 # select gather + sq/clip/mean
    else:
        flops = 12 * b * c * f + 5 * b * f      # ~6 MXU passes at HIGHEST
    cost = pl.CostEstimate(
        flops=int(flops),
        transcendentals=0,
        bytes_accessed=b * f * 4 + c * f * 4 + b * 4 + b * 4,
    )

    if single_buffer_centers:
        centers_spec = pl.BlockSpec((c, f), lambda i: (0, 0),
                                    pipeline_mode=pl.Buffered(1))
    else:
        centers_spec = pl.BlockSpec((c, f), lambda i: (0, 0))

    out = pl.pallas_call(
        _center_loss_kernel,
        out_shape=jax.ShapeDtypeStruct((1, b), jnp.float32),
        grid=grid,
        in_specs=[
            pl.BlockSpec((tb, 1), lambda i: (i, 0)),   # labels tile
            pl.BlockSpec((tb, f), lambda i: (i, 0)),   # x tile (streamed, double-buffered)
            centers_spec,                              # centers, resident across grid
        ],
        out_specs=pl.BlockSpec((1, tb), lambda i: (0, i)),   # lane-dense loss row
        compiler_params=pltpu.CompilerParams(
            dimension_semantics=("parallel",),   # shards batch across v7x's 2 TCs
            vmem_limit_bytes=vmem_limit,
        ),
        cost_estimate=cost,
    )(labels2d, x, centers)
    return out[0]  # (B,)


def center_loss_ref(x, centers, labels=None):
    if labels is None:
        labels = jnp.zeros((x.shape[0],), dtype=jnp.int32)
    center = centers[labels]
    dist = (x - center) ** 2
    return jnp.clip(dist, 1e-12, 1e12).mean(axis=-1)


if __name__ == "__main__":
    num_class = 10
    num_feature = 32
    batch = 8

    key = jax.random.PRNGKey(0)
    kx, kc, kl, krest = jax.random.split(key, 4)
    x = jax.random.normal(kx, (batch, num_feature), dtype=jnp.float32)
    # nn.Parameter(torch.randn(num_class, num_feature)) -> deterministic normal init
    centers = jax.random.normal(kc, (num_class, num_feature), dtype=jnp.float32)
    labels = jax.random.randint(kl, (batch,), 0, num_class, dtype=jnp.int32)

    # 1) Explicit labels, single tile, VPU select-gather path.
    loss = jax.block_until_ready(center_loss(x, centers, labels))
    ref = center_loss_ref(x, centers, labels)
    assert loss.shape == (batch,)
    assert jnp.allclose(loss, ref, rtol=1e-5, atol=1e-6), (loss, ref)

    # 2) labels=None (PyTorch default path: labels = zeros).
    loss0 = jax.block_until_ready(center_loss(x, centers, None))
    ref0 = center_loss_ref(x, centers, None)
    assert jnp.allclose(loss0, ref0, rtol=1e-5, atol=1e-6), (loss0, ref0)

    # 3) Multi-tile grid with a partial last block (pipelined path + boundary
    #    masking of the lane-dense output).
    batch2 = 300
    kx2, kl2, kx3, kc3 = jax.random.split(krest, 4)
    x2 = jax.random.normal(kx2, (batch2, num_feature), dtype=jnp.float32)
    labels2 = jax.random.randint(kl2, (batch2,), 0, num_class, dtype=jnp.int32)
    loss2 = jax.block_until_ready(center_loss(x2, centers, labels2, batch_tile=128))
    ref2 = center_loss_ref(x2, centers, labels2)
    assert loss2.shape == (batch2,)
    assert jnp.allclose(loss2, ref2, rtol=1e-5, atol=1e-6), (loss2, ref2)

    # 4) Large-C fallback path (one-hot MXU matmul, kept exact).
    big_c, big_f, batch3 = 80, 128, 16
    x3 = jax.random.normal(kx3, (batch3, big_f), dtype=jnp.float32)
    centers3 = jax.random.normal(kc3, (big_c, big_f), dtype=jnp.float32)
    labels3 = jax.random.randint(kl, (batch3,), 0, big_c, dtype=jnp.int32)
    loss3 = jax.block_until_ready(center_loss(x3, centers3, labels3))
    ref3 = center_loss_ref(x3, centers3, labels3)
    assert jnp.allclose(loss3, ref3, rtol=1e-5, atol=1e-6), (loss3, ref3)

    print("KERNEL_OK")
</pallas_src>

<mosaic_0001>
module attributes {stable_mosaic.version = 11 : i64} {
  func.func @_center_loss_kernel(%arg0: i32, %arg1: memref<128x1xi32, #tpu.memory_space<vmem>>, %arg2: memref<128x32xf32, #tpu.memory_space<vmem>>, %arg3: memref<10x32xf32, #tpu.memory_space<vmem>>, %arg4: memref<1x128xf32, #tpu.memory_space<vmem>>) attributes {dimension_semantics = [#tpu.dimension_semantics<parallel>], iteration_bounds = array<i64: 1>, scalar_prefetch = 0 : i64, scratch_operands = 0 : i64, tpu.core_type = #tpu.core_type<tc>, window_params = [{transform_indices = @transform_0, window_bounds = array<i64: 128, 1>}, {transform_indices = @transform_1, window_bounds = array<i64: 128, 32>}, {pipeline_mode = #tpu.pipeline_mode<synchronous>, transform_indices = @transform_2, window_bounds = array<i64: 10, 32>}, {transform_indices = @transform_3, window_bounds = array<i64: 1, 128>}]} {
    %c0 = arith.constant 0 : index
    %c0_0 = arith.constant 0 : index
    %0 = vector.load %arg1[%c0, %c0_0] : memref<128x1xi32, #tpu.memory_space<vmem>>, vector<128x1xi32>
    %c0_1 = arith.constant 0 : index
    %c0_2 = arith.constant 0 : index
    %1 = vector.load %arg2[%c0_1, %c0_2] : memref<128x32xf32, #tpu.memory_space<vmem>>, vector<128x32xf32>
    %c0_3 = arith.constant 0 : index
    %c0_4 = arith.constant 0 : index
    %2 = vector.load %arg3[%c0_3, %c0_4] : memref<10x32xf32, #tpu.memory_space<vmem>>, vector<10x32xf32>
    %cst = arith.constant 0.000000e+00 : f32
    %3 = vector.broadcast %cst : f32 to vector<128x32xf32>
    %4 = vector.extract_strided_slice %2 {offsets = [0, 0], sizes = [1, 32], strides = [1, 1]} : vector<10x32xf32> to vector<1x32xf32>
    %c0_i32 = arith.constant 0 : i32
    %5 = vector.broadcast %c0_i32 : i32 to vector<128x1xi32>
    %6 = arith.cmpi eq, %0, %5 : vector<128x1xi32>
    %7 = vector.shape_cast %6 : vector<128x1xi1> to vector<128x1xi1>
    %8 = vector.broadcast %7 : vector<128x1xi1> to vector<128x32xi1>
    %9 = vector.shape_cast %4 : vector<1x32xf32> to vector<1x32xf32>
    %10 = vector.broadcast %9 : vector<1x32xf32> to vector<128x32xf32>
    %11 = arith.select %8, %10, %3 : vector<128x32xi1>, vector<128x32xf32>
    %12 = vector.extract_strided_slice %2 {offsets = [1, 0], sizes = [1, 32], strides = [1, 1]} : vector<10x32xf32> to vector<1x32xf32>
    %c1_i32 = arith.constant 1 : i32
    %13 = vector.broadcast %c1_i32 : i32 to vector<128x1xi32>
    %14 = arith.cmpi eq, %0, %13 : vector<128x1xi32>
    %15 = vector.shape_cast %14 : vector<128x1xi1> to vector<128x1xi1>
    %16 = vector.broadcast %15 : vector<128x1xi1> to vector<128x32xi1>
    %17 = vector.shape_cast %12 : vector<1x32xf32> to vector<1x32xf32>
    %18 = vector.broadcast %17 : vector<1x32xf32> to vector<128x32xf32>
    %19 = arith.select %16, %18, %11 : vector<128x32xi1>, vector<128x32xf32>
    %20 = vector.extract_strided_slice %2 {offsets = [2, 0], sizes = [1, 32], strides = [1, 1]} : vector<10x32xf32> to vector<1x32xf32>
    %c2_i32 = arith.constant 2 : i32
    %21 = vector.broadcast %c2_i32 : i32 to vector<128x1xi32>
    %22 = arith.cmpi eq, %0, %21 : vector<128x1xi32>
    %23 = vector.shape_cast %22 : vector<128x1xi1> to vector<128x1xi1>
    %24 = vector.broadcast %23 : vector<128x1xi1> to vector<128x32xi1>
    %25 = vector.shape_cast %20 : vector<1x32xf32> to vector<1x32xf32>
    %26 = vector.broadcast %25 : vector<1x32xf32> to vector<128x32xf32>
    %27 = arith.select %24, %26, %19 : vector<128x32xi1>, vector<128x32xf32>
    %28 = vector.extract_strided_slice %2 {offsets = [3, 0], sizes = [1, 32], strides = [1, 1]} : vector<10x32xf32> to vector<1x32xf32>
    %c3_i32 = arith.constant 3 : i32
    %29 = vector.broadcast %c3_i32 : i32 to vector<128x1xi32>
    %30 = arith.cmpi eq, %0, %29 : vector<128x1xi32>
    %31 = vector.shape_cast %30 : vector<128x1xi1> to vector<128x1xi1>
    %32 = vector.broadcast %31 : vector<128x1xi1> to vector<128x32xi1>
    %33 = vector.shape_cast %28 : vector<1x32xf32> to vector<1x32xf32>
    %34 = vector.broadcast %33 : vector<1x32xf32> to vector<128x32xf32>
    %35 = arith.select %32, %34, %27 : vector<128x32xi1>, vector<128x32xf32>
    %36 = vector.extract_strided_slice %2 {offsets = [4, 0], sizes = [1, 32], strides = [1, 1]} : vector<10x32xf32> to vector<1x32xf32>
    %c4_i32 = arith.constant 4 : i32
    %37 = vector.broadcast %c4_i32 : i32 to vector<128x1xi32>
    %38 = arith.cmpi eq, %0, %37 : vector<128x1xi32>
    %39 = vector.shape_cast %38 : vector<128x1xi1> to vector<128x1xi1>
    %40 = vector.broadcast %39 : vector<128x1xi1> to vector<128x32xi1>
    %41 = vector.shape_cast %36 : vector<1x32xf32> to vector<1x32xf32>
    %42 = vector.broadcast %41 : vector<1x32xf32> to vector<128x32xf32>
    %43 = arith.select %40, %42, %35 : vector<128x32xi1>, vector<128x32xf32>
    %44 = vector.extract_strided_slice %2 {offsets = [5, 0], sizes = [1, 32], strides = [1, 1]} : vector<10x32xf32> to vector<1x32xf32>
    %c5_i32 = arith.constant 5 : i32
    %45 = vector.broadcast %c5_i32 : i32 to vector<128x1xi32>
    %46 = arith.cmpi eq, %0, %45 : vector<128x1xi32>
    %47 = vector.shape_cast %46 : vector<128x1xi1> to vector<128x1xi1>
    %48 = vector.broadcast %47 : vector<128x1xi1> to vector<128x32xi1>
    %49 = vector.shape_cast %44 : vector<1x32xf32> to vector<1x32xf32>
    %50 = vector.broadcast %49 : vector<1x32xf32> to vector<128x32xf32>
    %51 = arith.select %48, %50, %43 : vector<128x32xi1>, vector<128x32xf32>
    %52 = vector.extract_strided_slice %2 {offsets = [6, 0], sizes = [1, 32], strides = [1, 1]} : vector<10x32xf32> to vector<1x32xf32>
    %c6_i32 = arith.constant 6 : i32
    %53 = vector.broadcast %c6_i32 : i32 to vector<128x1xi32>
    %54 = arith.cmpi eq, %0, %53 : vector<128x1xi32>
    %55 = vector.shape_cast %54 : vector<128x1xi1> to vector<128x1xi1>
    %56 = vector.broadcast %55 : vector<128x1xi1> to vector<128x32xi1>
    %57 = vector.shape_cast %52 : vector<1x32xf32> to vector<1x32xf32>
    %58 = vector.broadcast %57 : vector<1x32xf32> to vector<128x32xf32>
    %59 = arith.select %56, %58, %51 : vector<128x32xi1>, vector<128x32xf32>
    %60 = vector.extract_strided_slice %2 {offsets = [7, 0], sizes = [1, 32], strides = [1, 1]} : vector<10x32xf32> to vector<1x32xf32>
    %c7_i32 = arith.constant 7 : i32
    %61 = vector.broadcast %c7_i32 : i32 to vector<128x1xi32>
    %62 = arith.cmpi eq, %0, %61 : vector<128x1xi32>
    %63 = vector.shape_cast %62 : vector<128x1xi1> to vector<128x1xi1>
    %64 = vector.broadcast %63 : vector<128x1xi1> to vector<128x32xi1>
    %65 = vector.shape_cast %60 : vector<1x32xf32> to vector<1x32xf32>
    %66 = vector.broadcast %65 : vector<1x32xf32> to vector<128x32xf32>
    %67 = arith.select %64, %66, %59 : vector<128x32xi1>, vector<128x32xf32>
    %68 = vector.extract_strided_slice %2 {offsets = [8, 0], sizes = [1, 32], strides = [1, 1]} : vector<10x32xf32> to vector<1x32xf32>
    %c8_i32 = arith.constant 8 : i32
    %69 = vector.broadcast %c8_i32 : i32 to vector<128x1xi32>
    %70 = arith.cmpi eq, %0, %69 : vector<128x1xi32>
    %71 = vector.shape_cast %70 : vector<128x1xi1> to vector<128x1xi1>
    %72 = vector.broadcast %71 : vector<128x1xi1> to vector<128x32xi1>
    %73 = vector.shape_cast %68 : vector<1x32xf32> to vector<1x32xf32>
    %74 = vector.broadcast %73 : vector<1x32xf32> to vector<128x32xf32>
    %75 = arith.select %72, %74, %67 : vector<128x32xi1>, vector<128x32xf32>
    %76 = vector.extract_strided_slice %2 {offsets = [9, 0], sizes = [1, 32], strides = [1, 1]} : vector<10x32xf32> to vector<1x32xf32>
    %c9_i32 = arith.constant 9 : i32
    %77 = vector.broadcast %c9_i32 : i32 to vector<128x1xi32>
    %78 = arith.cmpi eq, %0, %77 : vector<128x1xi32>
    %79 = vector.shape_cast %78 : vector<128x1xi1> to vector<128x1xi1>
    %80 = vector.broadcast %79 : vector<128x1xi1> to vector<128x32xi1>
    %81 = vector.shape_cast %76 : vector<1x32xf32> to vector<1x32xf32>
    %82 = vector.broadcast %81 : vector<1x32xf32> to vector<128x32xf32>
    %83 = arith.select %80, %82, %75 : vector<128x32xi1>, vector<128x32xf32>
    %84 = arith.subf %1, %83 : vector<128x32xf32>
    %85 = arith.mulf %84, %84 : vector<128x32xf32>
    %cst_5 = arith.constant 9.99999996E-13 : f32
    %cst_6 = arith.constant 9.99999995E+11 : f32
    %86 = vector.broadcast %cst_5 : f32 to vector<128x32xf32>
    %87 = arith.maximumf %86, %85 : vector<128x32xf32>
    %88 = vector.broadcast %cst_6 : f32 to vector<128x32xf32>
    %89 = arith.minimumf %88, %87 : vector<128x32xf32>
    %cst_7 = arith.constant dense<0.000000e+00> : vector<128xf32>
    %90 = vector.multi_reduction <add>, %89, %cst_7 [1] : vector<128x32xf32> to vector<128xf32>
    %cst_8 = arith.constant 3.200000e+01 : f32
    %91 = vector.broadcast %cst_8 : f32 to vector<128xf32>
    %92 = arith.divf %90, %91 : vector<128xf32>
    %93 = vector.shape_cast %92 : vector<128xf32> to vector<1x128xf32>
    %c0_9 = arith.constant 0 : index
    %c0_10 = arith.constant 0 : index
    %94 = vector.load %arg4[%c0_9, %c0_10] : memref<1x128xf32, #tpu.memory_space<vmem>>, vector<1x128xf32>
    tpu.vector_store %arg4[%c0_9, %c0_10], %93 {strides = array<i32>} : memref<1x128xf32, #tpu.memory_space<vmem>>, vector<1x128xf32>,
    return
  }
  func.func @transform_0(%arg0: i32) -> (i32, i32) {
    %c0_i32 = arith.constant 0 : i32
    %c0_i32_0 = arith.constant 0 : i32
    return %arg0, %c0_i32 : i32, i32
  }
  func.func @transform_1(%arg0: i32) -> (i32, i32) {
    %c0_i32 = arith.constant 0 : i32
    %c0_i32_0 = arith.constant 0 : i32
    return %arg0, %c0_i32 : i32, i32
  }
  func.func @transform_2(%arg0: i32) -> (i32, i32) {
    %c0_i32 = arith.constant 0 : i32
    %c0_i32_0 = arith.constant 0 : i32
    %c0_i32_1 = arith.constant 0 : i32
    return %c0_i32, %c0_i32_0 : i32, i32
  }
  func.func @transform_3(%arg0: i32) -> (i32, i32) {
    %c0_i32 = arith.constant 0 : i32
    %c0_i32_0 = arith.constant 0 : i32
    return %c0_i32, %arg0 : i32, i32
  }
}

</mosaic_0001>

<bundles_post_ra>
// kernel: tpu_custom_call.1
= control target key start
LH: loop header
LB: loop body
LE: loop exit
PB: predicated region body
PF: predicated region fallthrough
CT: control target
= control target key end

     0   :  { %8 = vsyncpa [#allocation3], 0  ;;  %s2625_s0 = inlined_call_operand.vmem [shape: s32[8,1], index: 0, kind: input, shape index: {}]   ;;  %s2626_s1 = inlined_call_operand.vmem [shape: f32[8,32], index: 1, kind: input, shape index: {}]   ;;  %s2627_s2 = inlined_call_operand.hbm [shape: f32[10,32], index: 2, kind: input, shape index: {}]   ;;  %s2628_s3 = inlined_call_operand.hbm [shape: f32[1,8], index: 3, kind: output, shape index: {}]  }
   0x1   :  { %9 = vsyncpa [#allocation4], 0  ;;  %s18_s14 = sshll.u32 %s2627_s2, 4  ;;  %s1508_s15 = smov [#allocation2]   ;;  %s19_s14 = int_to_ptr.hbm [resolvable:$true] %s18_s14 }
   0x2   :  { %s20_s16 = sshll.u32 %s1508_s15, 4  ;;  %s1509_s17 = smov 128   ;;  %s21_s16 = int_to_ptr.vmem [resolvable:$true] %s20_s16 }
   0x3   :  { %s1510_s18 = smov 8  }
   0x4   :  { %26 = dma.hbm_to_vmem [thread:$0]  %s19_s14, 256, %s21_s16, [#allocation3], %s1509_s17, %s1509_s17, %s1510_s18  }
   0x5   :  { %1504 = dma.done.wait [#allocation3], 256  }
   0x6   :  { %1505 = vsyncadd [#allocation3], 4294967040  ;;  %v2629_v0 = vmov 0   ;;  %v1543_v1 = vld [vmem:[%s2625_s0 + $0x20] sm:$0xff]  ;;  %v1548_v2 = vld [vmem:[%s2625_s0 + $0x10] sm:$0xff]  ;;  %s1419_s4 = sshll.u32 %s2628_s3, 4  ;;  %s1420_s4 = int_to_ptr.hbm [resolvable:$true] %s1419_s4 }
   0x7   :  { %1437 = vset.pattern.permute.xlu2 %v2629_v0  ;;  %1436 = vset.pattern.permute.xlu1 %v2629_v0  ;;  %v1553_v3 = vld [vmem:[%s2625_s0] sm:$0xff]  ;;  %vm69_vm0 = vcmp.eq.s32.totalorder %v1543_v1, 0  ;;  %vm67_vm1 = vcmp.eq.s32.totalorder %v1548_v2, 0  ;;  %v1564_v7 = vld [vmem:[%s2625_s0 + $0x28] sm:$0xff]  ;;  %v1569_v8 = vld [vmem:[%s2625_s0 + $0x18] sm:$0xff] }
   0x8   :  { %1435 = vset.pattern.permute.xlu0 %v2629_v0  ;;  %vm65_vm2 = vcmp.eq.s32.totalorder %v1553_v3, 0  ;;  %v85_v4 = vsel %vm69_vm0, 1, %v2629_v0  ;;  %v83_v5 = vsel %vm67_vm1, 1, %v2629_v0  ;;  %v1574_v9 = vld [vmem:[%s2625_s0 + $0x8] sm:$0xff]  ;;  %vm70_vm3 = vcmp.eq.s32.totalorder %v1564_v7, 0  ;;  %v1585_v13 = vld [vmem:[%s2625_s0 + $0x40] sm:$0xff] }
   0x9   :  { %v81_v6 = vsel %vm65_vm2, 1, %v2629_v0  ;;  %110 = vperm.xlu2 %1437, %v85_v4   ;;  %104 = vperm.xlu1 %1436, %v83_v5   ;;  %vm68_vm4 = vcmp.eq.s32.totalorder %v1569_v8, 0  ;;  %vm66_vm5 = vcmp.eq.s32.totalorder %v1574_v9, 0  ;;  %v86_v10 = vsel %vm70_vm3, 1, %v2629_v0  ;;  %v1590_v14 = vld [vmem:[%s2625_s0 + $0x38] sm:$0xff]  ;;  %v1595_v15 = vld [vmem:[%s2625_s0 + $0x30] sm:$0xff] }
   0xa   :  { %98 = vperm.xlu0 %1435, %v81_v6   ;;  %v84_v11 = vsel %vm68_vm4, 1, %v2629_v0  ;;  %v82_v12 = vsel %vm66_vm5, 1, %v2629_v0  ;;  %vm73_vm6 = vcmp.eq.s32.totalorder %v1585_v13, 0  ;;  %vm72_vm7 = vcmp.eq.s32.totalorder %v1590_v14, 0  ;;  %v1606_v19 = vld [vmem:[%s2625_s0 + $0x58] sm:$0xff]  ;;  %v1611_v20 = vld [vmem:[%s2625_s0 + $0x50] sm:$0xff] }
   0xb   :  { %vm71_vm8 = vcmp.eq.s32.totalorder %v1595_v15, 0  ;;  %v89_v16 = vsel %vm73_vm6, 1, %v2629_v0  ;;  %v88_v17 = vsel %vm72_vm7, 1, %v2629_v0  ;;  %v1616_v21 = vld [vmem:[%s2625_s0 + $0x48] sm:$0xff]  ;;  %vm76_vm9 = vcmp.eq.s32.totalorder %v1606_v19, 0  ;;  %v1627_v25 = vld [vmem:[%s2625_s0 + $0x70] sm:$0xff] }
   0xc   :  { %v87_v18 = vsel %vm71_vm8, 1, %v2629_v0  ;;  %vm75_vm10 = vcmp.eq.s32.totalorder %v1611_v20, 0  ;;  %vm74_vm11 = vcmp.eq.s32.totalorder %v1616_v21, 0  ;;  %v92_v22 = vsel %vm76_vm9, 1, %v2629_v0  ;;  %v1632_v26 = vld [vmem:[%s2625_s0 + $0x68] sm:$0xff]  ;;  %v1637_v27 = vld [vmem:[%s2625_s0 + $0x60] sm:$0xff] }
   0xd   :  { %v91_v23 = vsel %vm75_vm10, 1, %v2629_v0  ;;  %v90_v24 = vsel %vm74_vm11, 1, %v2629_v0  ;;  %vm79_vm12 = vcmp.eq.s32.totalorder %v1627_v25, 0  ;;  %vm78_vm13 = vcmp.eq.s32.totalorder %v1632_v26, 0  ;;  %v1648_v31 = vld [vmem:[%s2625_s0 + $0x78] sm:$0xff] }
   0xe   :  { %vm77_vm14 = vcmp.eq.s32.totalorder %v1637_v27, 0  ;;  %v95_v28 = vsel %vm79_vm12, 1, %v2629_v0  ;;  %v94_v29 = vsel %vm78_vm13, 1, %v2629_v0  ;;  %vm179_vm15 = vcmp.eq.s32.totalorder %v1574_v9, 1 }
   0xf   :  { %v93_v30 = vsel %vm77_vm14, 1, %v2629_v0  ;;  %vm178_vm0 = vcmp.eq.s32.totalorder %v1553_v3, 1  ;;  %vm80_vm1 = vcmp.eq.s32.totalorder %v1648_v31, 0  ;;  %v195_v32 = vsel %vm179_vm15, 1, %v2629_v0 }
  0x10   :  { %v194_v33 = vsel %vm178_vm0, 1, %v2629_v0  ;;  %v96_v34 = vsel %vm80_vm1, 1, %v2629_v0  ;;  %vm182_vm2 = vcmp.eq.s32.totalorder %v1543_v1, 1  ;;  %vm181_vm3 = vcmp.eq.s32.totalorder %v1569_v8, 1 }
  0x11   :  { %113 = vperm.xlu2 %1437, %v86_v10   ;;  %107 = vperm.xlu1 %1436, %v84_v11   ;;  %vm180_vm4 = vcmp.eq.s32.totalorder %v1548_v2, 1  ;;  %v198_v35 = vsel %vm182_vm2, 1, %v2629_v0  ;;  %v197_v36 = vsel %vm181_vm3, 1, %v2629_v0  ;;  %vm185_vm5 = vcmp.eq.s32.totalorder %v1590_v14, 1 }
  0x12   :  { %101 = vperm.xlu0 %1435, %v82_v12   ;;  %v196_v37 = vsel %vm180_vm4, 1, %v2629_v0  ;;  %vm184_vm6 = vcmp.eq.s32.totalorder %v1595_v15, 1  ;;  %vm183_vm7 = vcmp.eq.s32.totalorder %v1564_v7, 1  ;;  %v201_v38 = vsel %vm185_vm5, 1, %v2629_v0 }
  0x13   :  { %v200_v39 = vsel %vm184_vm6, 1, %v2629_v0  ;;  %v199_v40 = vsel %vm183_vm7, 1, %v2629_v0  ;;  %vm188_vm8 = vcmp.eq.s32.totalorder %v1611_v20, 1  ;;  %vm187_vm9 = vcmp.eq.s32.totalorder %v1616_v21, 1 }
  0x14   :  { %vm186_vm10 = vcmp.eq.s32.totalorder %v1585_v13, 1  ;;  %v204_v41 = vsel %vm188_vm8, 1, %v2629_v0  ;;  %v203_v42 = vsel %vm187_vm9, 1, %v2629_v0  ;;  %vm191_vm11 = vcmp.eq.s32.totalorder %v1632_v26, 1 }
  0x15   :  { %v202_v43 = vsel %vm186_vm10, 1, %v2629_v0  ;;  %vm190_vm12 = vcmp.eq.s32.totalorder %v1637_v27, 1  ;;  %vm189_vm13 = vcmp.eq.s32.totalorder %v1606_v19, 1  ;;  %v207_v44 = vsel %vm191_vm11, 1, %v2629_v0 }
  0x16   :  { %v206_v45 = vsel %vm190_vm12, 1, %v2629_v0  ;;  %v205_v46 = vsel %vm189_vm13, 1, %v2629_v0  ;;  %vm291_vm14 = vcmp.eq.s32.totalorder %v1553_v3, 2  ;;  %vm193_vm15 = vcmp.eq.s32.totalorder %v1648_v31, 1 }
  0x17   :  { %vm192_vm0 = vcmp.eq.s32.totalorder %v1627_v25, 1  ;;  %v307_v47 = vsel %vm291_vm14, 1, %v2629_v0  ;;  %v209_v48 = vsel %vm193_vm15, 1, %v2629_v0  ;;  %vm294_vm1 = vcmp.eq.s32.totalorder %v1569_v8, 2 }
  0x18   :  { %v208_v49 = vsel %vm192_vm0, 1, %v2629_v0  ;;  %vm293_vm2 = vcmp.eq.s32.totalorder %v1548_v2, 2  ;;  %vm292_vm3 = vcmp.eq.s32.totalorder %v1574_v9, 2  ;;  %v310_v50 = vsel %vm294_vm1, 1, %v2629_v0 }
  0x19   :  { %122 = vperm.xlu2 %1437, %v89_v16   ;;  %119 = vperm.xlu1 %1436, %v88_v17   ;;  %v309_v51 = vsel %vm293_vm2, 1, %v2629_v0  ;;  %v308_v52 = vsel %vm292_vm3, 1, %v2629_v0  ;;  %vm297_vm4 = vcmp.eq.s32.totalorder %v1595_v15, 2  ;;  %vm296_vm5 = vcmp.eq.s32.totalorder %v1564_v7, 2 }
  0x1a   :  { %116 = vperm.xlu0 %1435, %v87_v18   ;;  %vm295_vm6 = vcmp.eq.s32.totalorder %v1543_v1, 2  ;;  %v313_v54 = vsel %vm297_vm4, 1, %v2629_v0  ;;  %v312_v55 = vsel %vm296_vm5, 1, %v2629_v0  ;;  %vm300_vm7 = vcmp.eq.s32.totalorder %v1616_v21, 2 }
  0x1b   :  { %v311_v56 = vsel %vm295_vm6, 1, %v2629_v0  ;;  %vm299_vm8 = vcmp.eq.s32.totalorder %v1585_v13, 2  ;;  %vm298_vm9 = vcmp.eq.s32.totalorder %v1590_v14, 2  ;;  %v316_v58 = vsel %vm300_vm7, 1, %v2629_v0 }
  0x1c   :  { %v315_v59 = vsel %vm299_vm8, 1, %v2629_v0  ;;  %v314_v60 = vsel %vm298_vm9, 1, %v2629_v0  ;;  %vm303_vm10 = vcmp.eq.s32.totalorder %v1637_v27, 2  ;;  %vm302_vm11 = vcmp.eq.s32.totalorder %v1606_v19, 2 }
  0x1d   :  { %vm301_vm12 = vcmp.eq.s32.totalorder %v1611_v20, 2  ;;  %v319_v62 = vsel %vm303_vm10, 1, %v2629_v0  ;;  %v318_v63 = vsel %vm302_vm11, 1, %v2629_v0  ;;  %vm306_vm13 = vcmp.eq.s32.totalorder %v1648_v31, 2 }
  0x1e   :  { %v317_v4 = vsel %vm301_vm12, 1, %v2629_v0  ;;  %vm305_vm14 = vcmp.eq.s32.totalorder %v1627_v25, 2  ;;  %vm304_vm15 = vcmp.eq.s32.totalorder %v1632_v26, 2  ;;  %v322_v11 = vsel %vm306_vm13, 1, %v2629_v0 }
  0x1f   :  { %v321_v12 = vsel %vm305_vm14, 1, %v2629_v0  ;;  %v320_v16 = vsel %vm304_vm15, 1, %v2629_v0  ;;  %vm406_vm0 = vcmp.eq.s32.totalorder %v1548_v2, 3  ;;  %vm405_vm1 = vcmp.eq.s32.totalorder %v1574_v9, 3 }
  0x20   :  { %vm404_vm2 = vcmp.eq.s32.totalorder %v1553_v3, 3  ;;  %vm409_vm3 = vcmp.eq.s32.totalorder %v1564_v7, 3  ;;  %vm408_vm4 = vcmp.eq.s32.totalorder %v1543_v1, 3  ;;  %vm407_vm5 = vcmp.eq.s32.totalorder %v1569_v8, 3 }
  0x21   :  { %131 = vperm.xlu2 %1437, %v92_v22   ;;  %128 = vperm.xlu1 %1436, %v91_v23   ;;  %v422_v23 = vsel %vm406_vm0, 1, %v2629_v0  ;;  %vm412_vm6 = vcmp.eq.s32.totalorder %v1585_v13, 3  ;;  %vm411_vm7 = vcmp.eq.s32.totalorder %v1590_v14, 3  ;;  %vm410_vm8 = vcmp.eq.s32.totalorder %v1595_v15, 3 }
  0x22   :  { %125 = vperm.xlu0 %1435, %v90_v24   ;;  %v421_v24 = vsel %vm405_vm1, 1, %v2629_v0  ;;  %vm415_vm9 = vcmp.eq.s32.totalorder %v1606_v19, 3  ;;  %vm414_vm10 = vcmp.eq.s32.totalorder %v1611_v20, 3  ;;  %vm413_vm11 = vcmp.eq.s32.totalorder %v1616_v21, 3 }
  0x23   :  { %vm418_vm12 = vcmp.eq.s32.totalorder %v1627_v25, 3  ;;  %vm417_vm13 = vcmp.eq.s32.totalorder %v1632_v26, 3  ;;  %vm416_vm14 = vcmp.eq.s32.totalorder %v1637_v27, 3  ;;  %vm518_vm15 = vcmp.eq.s32.totalorder %v1574_v9, 4 }
  0x24   :  { %vm517_vm0 = vcmp.eq.s32.totalorder %v1553_v3, 4  ;;  %vm419_vm1 = vcmp.eq.s32.totalorder %v1648_v31, 3 }
  0x29   :  { %140 = vperm.xlu2 %1437, %v95_v28   ;;  %137 = vperm.xlu1 %1436, %v94_v29   ;;  %v420_v28 = vsel %vm404_vm2, 1, %v2629_v0  ;;  %vm521_vm2 = vcmp.eq.s32.totalorder %v1543_v1, 4 }
  0x2a   :  { %134 = vperm.xlu0 %1435, %v93_v30  }
  0x31   :  { %214 = vperm.xlu2 %1437, %v195_v32   ;;  %211 = vperm.xlu1 %1436, %v194_v33   ;;  %v425_v33 = vsel %vm409_vm3, 1, %v2629_v0  ;;  %vm520_vm3 = vcmp.eq.s32.totalorder %v1569_v8, 4 }
  0x32   :  { %143 = vperm.xlu0 %1435, %v96_v34   ;;  %v424_v34 = vsel %vm408_vm4, 1, %v2629_v0  ;;  %vm519_vm4 = vcmp.eq.s32.totalorder %v1548_v2, 4 }
  0x39   :  { %223 = vperm.xlu2 %1437, %v198_v35   ;;  %220 = vperm.xlu1 %1436, %v197_v36   ;;  %v423_v35 = vsel %vm407_vm5, 1, %v2629_v0  ;;  %vm524_vm5 = vcmp.eq.s32.totalorder %v1590_v14, 4 }
  0x3a   :  { %217 = vperm.xlu0 %1435, %v196_v37  }
  0x41   :  { %232 = vperm.xlu2 %1437, %v201_v38   ;;  %229 = vperm.xlu1 %1436, %v200_v39   ;;  %v428_v39 = vsel %vm412_vm6, 1, %v2629_v0  ;;  %vm523_vm6 = vcmp.eq.s32.totalorder %v1595_v15, 4 }
  0x42   :  { %226 = vperm.xlu0 %1435, %v199_v40   ;;  %v427_v40 = vsel %vm411_vm7, 1, %v2629_v0  ;;  %vm522_vm7 = vcmp.eq.s32.totalorder %v1564_v7, 4 }
  0x49   :  { %241 = vperm.xlu2 %1437, %v204_v41   ;;  %238 = vperm.xlu1 %1436, %v203_v42   ;;  %v426_v41 = vsel %vm410_vm8, 1, %v2629_v0  ;;  %vm527_vm8 = vcmp.eq.s32.totalorder %v1611_v20, 4 }
  0x4a   :  { %235 = vperm.xlu0 %1435, %v202_v43  }
  0x51   :  { %250 = vperm.xlu2 %1437, %v207_v44   ;;  %247 = vperm.xlu1 %1436, %v206_v45   ;;  %v431_v45 = vsel %vm415_vm9, 1, %v2629_v0  ;;  %vm526_vm9 = vcmp.eq.s32.totalorder %v1616_v21, 4 }
  0x52   :  { %244 = vperm.xlu0 %1435, %v205_v46   ;;  %v430_v46 = vsel %vm414_vm10, 1, %v2629_v0  ;;  %vm525_vm10 = vcmp.eq.s32.totalorder %v1585_v13, 4 }
  0x59   :  { %324 = vperm.xlu2 %1437, %v307_v47   ;;  %256 = vperm.xlu1 %1436, %v209_v48   ;;  %v429_v47 = vsel %vm413_vm11, 1, %v2629_v0  ;;  %vm530_vm11 = vcmp.eq.s32.totalorder %v1632_v26, 4 }
  0x5a   :  { %253 = vperm.xlu0 %1435, %v208_v49  }
  0x61   :  { %333 = vperm.xlu2 %1437, %v310_v50   ;;  %330 = vperm.xlu1 %1436, %v309_v51   ;;  %v434_v51 = vsel %vm418_vm12, 1, %v2629_v0  ;;  %vm529_vm12 = vcmp.eq.s32.totalorder %v1637_v27, 4 }
  0x62   :  { %327 = vperm.xlu0 %1435, %v308_v52   ;;  %v433_v52 = vsel %vm417_vm13, 1, %v2629_v0  ;;  %vm528_vm13 = vcmp.eq.s32.totalorder %v1606_v19, 4 }
  0x63   :  { %v1692_v53 = vpop.permute.xlu2 %110 }
  0x69   :  { %342 = vperm.xlu2 %1437, %v313_v54   ;;  %339 = vperm.xlu1 %1436, %v312_v55   ;;  %v432_v54 = vsel %vm416_vm14, 1, %v2629_v0 }
  0x6a   :  { %336 = vperm.xlu0 %1435, %v311_v56  }
  0x6b   :  { %v1700_v57 = vpop.permute.xlu2 %113 }
  0x71   :  { %351 = vperm.xlu2 %1437, %v316_v58   ;;  %348 = vperm.xlu1 %1436, %v315_v59   ;;  %v534_v59 = vsel %vm518_vm15, 1, %v2629_v0 }
  0x72   :  { %345 = vperm.xlu0 %1435, %v314_v60   ;;  %v533_v60 = vsel %vm517_vm0, 1, %v2629_v0  ;;  %vm630_vm0 = vcmp.eq.s32.totalorder %v1553_v3, 5 }
  0x73   :  { %v1708_v61 = vpop.permute.xlu2 %122 }
  0x79   :  { %360 = vperm.xlu2 %1437, %v319_v62   ;;  %357 = vperm.xlu1 %1436, %v318_v63   ;;  %v435_v62 = vsel %vm419_vm1, 1, %v2629_v0  ;;  %vm532_vm1 = vcmp.eq.s32.totalorder %v1648_v31, 4 }
  0x7a   :  { %354 = vperm.xlu0 %1435, %v317_v4  }
  0x7b   :  { %v1716_v5 = vpop.permute.xlu2 %131  ;;  %v1718_v6 = vpop.permute.xlu1 %104 }
  0x7c   :  { %v1722_v10 = vpop.permute.xlu0 %98 }
  0x81   :  { %369 = vperm.xlu2 %1437, %v322_v11   ;;  %366 = vperm.xlu1 %1436, %v321_v12   ;;  %v537_v12 = vsel %vm521_vm2, 1, %v2629_v0 }
  0x82   :  { %363 = vperm.xlu0 %1435, %v320_v16   ;;  %v536_v16 = vsel %vm520_vm3, 1, %v2629_v0  ;;  %vm531_vm3 = vcmp.eq.s32.totalorder %v1627_v25, 4 }
  0x83   :  { %v1728_v17 = vpop.permute.xlu2 %140  ;;  %v1730_v18 = vpop.permute.xlu1 %107 }
  0x84   :  { %v1734_v22 = vpop.permute.xlu0 %101 }
  0x89   :  { %443 = vperm.xlu2 %1437, %v422_v23   ;;  %440 = vperm.xlu1 %1436, %v421_v24   ;;  %v535_v23 = vsel %vm519_vm4, 1, %v2629_v0 }
  0x8a   :  { %437 = vperm.xlu0 %1435, %v420_v28  }
  0x8b   :  { %v1740_v29 = vpop.permute.xlu1 %119  ;;  %v1742_v30 = vpop.permute.xlu2 %214 }
  0x8c   :  { %v1746_v32 = vpop.permute.xlu0 %116 }
  0x91   :  { %452 = vperm.xlu2 %1437, %v425_v33   ;;  %449 = vperm.xlu1 %1436, %v424_v34   ;;  %v540_v34 = vsel %vm524_vm5, 1, %v2629_v0 }
  0x92   :  { %446 = vperm.xlu0 %1435, %v423_v35   ;;  %v539_v35 = vsel %vm523_vm6, 1, %v2629_v0  ;;  %vm633_vm6 = vcmp.eq.s32.totalorder %v1569_v8, 5 }
  0x93   :  { %v1752_v36 = vpop.permute.xlu1 %128  ;;  %v1754_v37 = vpop.permute.xlu2 %223 }
  0x94   :  { %v1758_v38 = vpop.permute.xlu0 %125 }
  0x99   :  { %461 = vperm.xlu2 %1437, %v428_v39   ;;  %458 = vperm.xlu1 %1436, %v427_v40   ;;  %v538_v39 = vsel %vm522_vm7, 1, %v2629_v0  ;;  %vm632_vm7 = vcmp.eq.s32.totalorder %v1548_v2, 5 }
  0x9a   :  { %455 = vperm.xlu0 %1435, %v426_v41  }
  0x9b   :  { %v1764_v42 = vpop.permute.xlu1 %137  ;;  %v1766_v43 = vpop.permute.xlu2 %232 }
  0x9c   :  { %v1770_v44 = vpop.permute.xlu0 %134 }
  0x9d   :  { %vm157_vm14 = vcmp.eq.s32.totalorder %v1770_v44, 1 }
  0xa1   :  { %470 = vperm.xlu2 %1437, %v431_v45   ;;  %467 = vperm.xlu1 %1436, %v430_v46   ;;  %v543_v46 = vsel %vm527_vm8, 1, %v2629_v0 }
  0xa2   :  { %464 = vperm.xlu0 %1435, %v429_v47   ;;  %v542_v47 = vsel %vm526_vm9, 1, %v2629_v0  ;;  %vm631_vm9 = vcmp.eq.s32.totalorder %v1574_v9, 5 }
  0xa3   :  { %v1776_v48 = vpop.permute.xlu2 %241  ;;  %v1778_v49 = vpop.permute.xlu1 %211 }
  0xa4   :  { %v1782_v50 = vpop.permute.xlu0 %143 }
  0xa5   :  { %vm160_vm4 = vcmp.eq.s32.totalorder %v1782_v50, 1 }
  0xa9   :  { %479 = vperm.xlu2 %1437, %v434_v51   ;;  %476 = vperm.xlu1 %1436, %v433_v52   ;;  %v541_v51 = vsel %vm525_vm10, 1, %v2629_v0  ;;  %vm147_vm10 = vcmp.eq.s32.totalorder %v1718_v6, 1 }
  0xaa   :  { %473 = vperm.xlu0 %1435, %v432_v54  }
  0xab   :  { %v1788_v55 = vpop.permute.xlu2 %250  ;;  %v1790_v56 = vpop.permute.xlu1 %220 }
  0xac   :  { %2631 = vst [vmem:[#allocation8_spill] sm:$0xff] %v1788_v55  ;;  %v1794_v58 = vpop.permute.xlu0 %217 }
  0xb1   :  { %553 = vperm.xlu2 %1437, %v534_v59   ;;  %550 = vperm.xlu1 %1436, %v533_v60   ;;  %v1841_v60 = vld [vmem:[#allocation2] sm:$0xff] }
  0xb2   :  { %482 = vperm.xlu0 %1435, %v435_v62   ;;  %v546_v62 = vsel %vm530_vm11, 1, %v2629_v0  ;;  %vm260_vm11 = vcmp.eq.s32.totalorder %v1794_v58, 1 }
  0xb3   :  { %v1800_v63 = vpop.permute.xlu2 %324  ;;  %v1802_v4 = vpop.permute.xlu1 %229 }
  0xb4   :  { %v1806_v11 = vpop.permute.xlu0 %226 }
  0xb9   :  { %562 = vperm.xlu2 %1437, %v537_v12   ;;  %559 = vperm.xlu1 %1436, %v536_v16   ;;  %v545_v12 = vsel %vm529_vm12, 1, %v2629_v0  ;;  %v544_v16 = vsel %vm528_vm13, 1, %v2629_v0  ;;  %vm636_vm13 = vcmp.eq.s32.totalorder %v1595_v15, 5 }
  0xba   :  { %556 = vperm.xlu0 %1435, %v535_v23   ;;  %v1848_v23 = vperm.slane %v1841_v60, 0 }
  0xbb   :  { %v1812_v24 = vpop.permute.xlu2 %333  ;;  %v1814_v28 = vpop.permute.xlu1 %238 }
  0xbc   :  { %v1818_v33 = vpop.permute.xlu0 %235 }
  0xc1   :  { %571 = vperm.xlu2 %1437, %v540_v34   ;;  %568 = vperm.xlu1 %1436, %v539_v35   ;;  %v1851_v34 = vperm.slane %v1841_v60, 1  ;;  %v174_v35 = vsel %vm157_vm14, %v1848_v23, 0.0  ;;  %vm635_vm14 = vcmp.eq.s32.totalorder %v1564_v7, 5 }
  0xc2   :  { %565 = vperm.xlu0 %1435, %v538_v39   ;;  %v1855_v39 = vperm.slane %v1841_v60, 2 }
  0xc3   :  { %v1824_v40 = vpop.permute.xlu2 %342  ;;  %v248_v41 = vpop.permute.xlu1 %247 }
  0xc4   :  { %v1828_v45 = vpop.permute.xlu0 %244  ;;  %vm270_vm15 = vcmp.eq.s32.totalorder %v248_v41, 1 }
  0xc5   :  { %v287_v44 = vsel %vm270_vm15, %v1851_v34, %v174_v35  ;;  %v177_v35 = vsel %vm160_vm4, %v1848_v23, 0.0  ;;  %vm639_vm4 = vcmp.eq.s32.totalorder %v1616_v21, 5 }
  0xc9   :  { %580 = vperm.xlu2 %1437, %v543_v46   ;;  %577 = vperm.xlu1 %1436, %v542_v47  }
  0xca   :  { %574 = vperm.xlu0 %1435, %v541_v51  }
  0xcb   :  { %v1834_v52 = vpop.permute.xlu2 %351  ;;  %v257_v54 = vpop.permute.xlu1 %256 }
  0xcc   :  { %v1838_v59 = vpop.permute.xlu0 %253  ;;  %vm273_vm5 = vcmp.eq.s32.totalorder %v257_v54, 1  ;;  %v649_v54 = vsel %vm633_vm6, 1, %v2629_v0 }
  0xd1   :  { %589 = vperm.xlu2 %1437, %v546_v62   ;;  %586 = vperm.xlu1 %1436, %v545_v12   ;;  %v646_v62 = vsel %vm630_vm0, 1, %v2629_v0  ;;  %v548_v12 = vsel %vm532_vm1, 1, %v2629_v0  ;;  %vm634_vm0 = vcmp.eq.s32.totalorder %v1543_v1, 5  ;;  %vm150_vm1 = vcmp.eq.s32.totalorder %v1700_v57, 1 }
  0xd2   :  { %583 = vperm.xlu0 %1435, %v544_v16   ;;  %v547_v16 = vsel %vm531_vm3, 1, %v2629_v0 }
  0xd3   :  { %v361_v46 = vpop.permute.xlu2 %360  ;;  %v331_v47 = vpop.permute.xlu1 %330 }
  0xd4   :  { %vm383_vm2 = vcmp.eq.s32.totalorder %v361_v46, 1  ;;  %v1860_v41 = vpop.permute.xlu0 %327  ;;  %vm373_vm12 = vcmp.eq.s32.totalorder %v331_v47, 1 }
  0xd5   :  { %v1864_v51 = vsel %vm383_vm2, %v1855_v39, %v287_v44  ;;  %v290_v44 = vsel %vm273_vm5, %v1851_v34, %v177_v35  ;;  %v164_v35 = vsel %vm147_vm10, %v1848_v23, 0.0  ;;  %vm263_vm2 = vcmp.eq.s32.totalorder %v1806_v11, 1 }
  0xd6   :  { %2632 = vst [vmem:[#allocation9_spill] sm:$0xff] %v1864_v51  ;;  %vm638_vm5 = vcmp.eq.s32.totalorder %v1585_v13, 5  ;;  %v2634_v11 = vmov 0   ;;  %vm266_vm10 = vcmp.eq.s32.totalorder %v1818_v33, 1 }
  0xd9   :  { %663 = vperm.xlu2 %1437, %v646_v62   ;;  %595 = vperm.xlu1 %1436, %v548_v12   ;;  %v648_v62 = vsel %vm632_vm7, 1, %v2629_v0  ;;  %v647_v12 = vsel %vm631_vm9, 1, %v2629_v0  ;;  %vm637_vm7 = vcmp.eq.s32.totalorder %v1590_v14, 5  ;;  %vm159_vm9 = vcmp.eq.s32.totalorder %v1728_v17, 1 }
  0xda   :  { %592 = vperm.xlu0 %1435, %v547_v16   ;;  %v1886_v16 = vperm.slane %v1841_v60, 3 }
  0xdb   :  { %v370_v46 = vpop.permute.xlu2 %369  ;;  %v340_v55 = vpop.permute.xlu1 %339 }
  0xdc   :  { %vm386_vm8 = vcmp.eq.s32.totalorder %v370_v46, 1  ;;  %v1874_v51 = vpop.permute.xlu0 %336  ;;  %v277_v46 = vsel %vm260_vm11, %v1851_v34, %v164_v35  ;;  %vm376_vm3 = vcmp.eq.s32.totalorder %v340_v55, 1  ;;  %v167_v35 = vsel %vm150_vm1, %v1848_v23, 0.0 }
  0xdd   :  { %v1878_v50 = vsel %vm386_vm8, %v1855_v39, %v290_v44  ;;  %v390_v6 = vsel %vm373_vm12, %v1855_v39, %v277_v46  ;;  %v280_v46 = vsel %vm263_vm2, %v1851_v34, %v167_v35  ;;  %vm153_vm8 = vcmp.eq.s32.totalorder %v1708_v61, 1 }
  0xde   :  { %2633 = vst [vmem:[#allocation10_spill] sm:$0xff] %v1878_v50  ;;  %v393_v57 = vsel %vm376_vm3, %v1855_v39, %v280_v46  ;;  %vm272_vm11 = vcmp.eq.s32.totalorder %v1838_v59, 1  ;;  %v170_v35 = vsel %vm153_vm8, %v1848_v23, 0.0  ;;  %v176_v46 = vsel %vm159_vm9, %v1848_v23, 0.0 }
  0xdf   :  { %v289_v61 = vsel %vm272_vm11, %v1851_v34, %v176_v46  ;;  %vm640_vm1 = vcmp.eq.s32.totalorder %v1611_v20, 5  ;;  %vm145_vm2 = vcmp.eq.s32.totalorder %v1722_v10, 1  ;;  %vm146_vm3 = vcmp.eq.s32.totalorder %v1734_v22, 1 }
  0xe0   :  { %vm372_vm8 = vcmp.eq.s32.totalorder %v1860_v41, 1  ;;  %v162_v10 = vsel %vm145_vm2, %v1848_v23, 0.0  ;;  %v163_v22 = vsel %vm146_vm3, %v1848_v23, 0.0  ;;  %vm645_vm11 = vcmp.eq.s32.totalorder %v1648_v31, 5 }
  0xe1   :  { %672 = vperm.xlu2 %1437, %v649_v54   ;;  %669 = vperm.xlu1 %1436, %v648_v62   ;;  %v652_v54 = vsel %vm636_vm13, 1, %v2629_v0  ;;  %v651_v62 = vsel %vm635_vm14, 1, %v2629_v0  ;;  %vm642_vm13 = vcmp.eq.s32.totalorder %v1637_v27, 5  ;;  %vm641_vm14 = vcmp.eq.s32.totalorder %v1606_v19, 5 }
  0xe2   :  { %666 = vperm.xlu0 %1435, %v647_v12   ;;  %v650_v12 = vsel %vm634_vm0, 1, %v2629_v0  ;;  %vm148_vm2 = vcmp.eq.s32.totalorder %v1730_v18, 1  ;;  %vm262_vm3 = vcmp.eq.s32.totalorder %v1754_v37, 1 }
  0xe3   :  { %v444_v44 = vpop.permute.xlu2 %443  ;;  %v349_v50 = vpop.permute.xlu1 %348 }
  0xe4   :  { %vm486_vm15 = vcmp.eq.s32.totalorder %v444_v44, 1  ;;  %v1893_v58 = vpop.permute.xlu0 %345  ;;  %vm379_vm12 = vcmp.eq.s32.totalorder %v349_v50, 1 }
  0xe5   :  { %v1897_v47 = vsel %vm486_vm15, %v1886_v16, %v390_v6 }
  0xe9   :  { %681 = vperm.xlu2 %1437, %v652_v54   ;;  %678 = vperm.xlu1 %1436, %v651_v62   ;;  %v655_v54 = vsel %vm639_vm4, 1, %v2634_v11  ;;  %v654_v62 = vsel %vm638_vm5, 1, %v2634_v11  ;;  %vm156_vm4 = vcmp.eq.s32.totalorder %v1716_v5, 1  ;;  %vm259_vm5 = vcmp.eq.s32.totalorder %v1742_v30, 1 }
  0xea   :  { %675 = vperm.xlu0 %1435, %v650_v12   ;;  %v653_v12 = vsel %vm637_vm7, 1, %v2634_v11  ;;  %vm269_vm7 = vcmp.eq.s32.totalorder %v1828_v45, 1  ;;  %v173_v46 = vsel %vm156_vm4, %v1848_v23, 0.0  ;;  %v276_v5 = vsel %vm259_vm5, %v1851_v34, %v163_v22 }
  0xeb   :  { %v453_v44 = vpop.permute.xlu2 %452  ;;  %v358_v6 = vpop.permute.xlu1 %357  ;;  %v389_v45 = vsel %vm372_vm8, %v1855_v39, %v276_v5  ;;  %vm261_vm4 = vcmp.eq.s32.totalorder %v1790_v56, 1  ;;  %vm375_vm5 = vcmp.eq.s32.totalorder %v1874_v51, 1  ;;  %v165_v22 = vsel %vm148_vm2, %v1848_v23, 0.0 }
  0xec   :  { %vm489_vm6 = vcmp.eq.s32.totalorder %v453_v44, 1  ;;  %v1909_v0 = vpop.permute.xlu0 %354  ;;  %v283_v44 = vsel %vm266_vm10, %v1851_v34, %v170_v35  ;;  %v656_v35 = vsel %vm640_vm1, 1, %v2634_v11  ;;  %vm382_vm9 = vcmp.eq.s32.totalorder %v358_v6, 1 }
  0xed   :  { %v1913_v55 = vsel %vm489_vm6, %v1886_v16, %v393_v57  ;;  %v396_v33 = vsel %vm379_vm12, %v1855_v39, %v283_v44  ;;  %vm258_vm6 = vcmp.eq.s32.totalorder %v1778_v49, 1  ;;  %vm371_vm10 = vcmp.eq.s32.totalorder %v1800_v63, 1 }
  0xee   :  { %v275_v30 = vsel %vm258_vm6, %v1851_v34, %v162_v10  ;;  %v286_v49 = vsel %vm269_vm7, %v1851_v34, %v173_v46  ;;  %vm644_vm12 = vcmp.eq.s32.totalorder %v1627_v25, 5  ;;  %vm149_vm1 = vcmp.eq.s32.totalorder %v1692_v53, 1 }
  0xef   :  { %v399_v6 = vsel %vm382_vm9, %v1855_v39, %v286_v49  ;;  %v388_v63 = vsel %vm371_vm10, %v1855_v39, %v275_v30  ;;  %v166_v10 = vsel %vm149_vm1, %v1848_v23, 0.0  ;;  %vm374_vm6 = vcmp.eq.s32.totalorder %v1812_v24, 1 }
  0xf0   :  { %v279_v53 = vsel %vm262_vm3, %v1851_v34, %v166_v10  ;;  %v278_v18 = vsel %vm261_vm4, %v1851_v34, %v165_v22  ;;  %vm745_vm7 = vcmp.eq.s32.totalorder %v1548_v2, 6  ;;  %vm744_vm8 = vcmp.eq.s32.totalorder %v1574_v9, 6 }
  0xf1   :  { %690 = vperm.xlu2 %1437, %v655_v54   ;;  %687 = vperm.xlu1 %1436, %v654_v62   ;;  %v658_v62 = vsel %vm642_vm13, 1, %v2634_v11  ;;  %v392_v37 = vsel %vm375_vm5, %v1855_v39, %v279_v53  ;;  %v391_v24 = vsel %vm374_vm6, %v1855_v39, %v278_v18  ;;  %v761_v9 = vsel %vm745_vm7, 1, %v2634_v11 }
  0xf2   :  { %684 = vperm.xlu0 %1435, %v653_v12   ;;  %v657_v12 = vsel %vm641_vm14, 1, %v2634_v11  ;;  %v760_v49 = vsel %vm744_vm8, 1, %v2634_v11  ;;  %vm378_vm1 = vcmp.eq.s32.totalorder %v1893_v58, 1  ;;  %vm377_vm2 = vcmp.eq.s32.totalorder %v1824_v40, 1 }
  0xf3   :  { %v462_v57 = vpop.permute.xlu2 %461  ;;  %v367_v17 = vpop.permute.xlu1 %366  ;;  %vm748_vm3 = vcmp.eq.s32.totalorder %v1564_v7, 6  ;;  %vm747_vm4 = vcmp.eq.s32.totalorder %v1543_v1, 6  ;;  %vm746_vm7 = vcmp.eq.s32.totalorder %v1569_v8, 6 }
  0xf4   :  { %vm492_vm15 = vcmp.eq.s32.totalorder %v462_v57, 1  ;;  %vm385_vm0 = vcmp.eq.s32.totalorder %v367_v17, 1  ;;  %v1929_v59 = vpop.permute.xlu0 %363  ;;  %v764_v1 = vsel %vm748_vm3, 1, %v2634_v11  ;;  %v763_v7 = vsel %vm747_vm4, 1, %v2634_v11 }
  0xf5   :  { %v1933_v50 = vsel %vm492_vm15, %v1886_v16, %v396_v33  ;;  %v1936_v54 = vsel %vm385_vm0, %v1855_v39, %v289_v61  ;;  %vm643_vm15 = vcmp.eq.s32.totalorder %v1632_v26, 5  ;;  %v762_v8 = vsel %vm746_vm7, 1, %v2634_v11 }
  0xf6   :  { %vm749_vm3 = vcmp.eq.s32.totalorder %v1595_v15, 6  ;;  %v2635_v15 = vld [vmem:[#allocation8_spill] sm:$0xff]  ;;  %vm384_vm7 = vcmp.eq.s32.totalorder %v1929_v59, 1 }
  0xf7   :  { %v765_v53 = vsel %vm749_vm3, 1, %v2634_v11 }
  0xf9   :  { %699 = vperm.xlu2 %1437, %v658_v62   ;;  %696 = vperm.xlu1 %1436, %v657_v12   ;;  %v661_v62 = vsel %vm645_vm11, 1, %v2634_v11  ;;  %v660_v12 = vsel %vm644_vm12, 1, %v2634_v11  ;;  %vm743_vm11 = vcmp.eq.s32.totalorder %v1553_v3, 6 }
  0xfa   :  { %693 = vperm.xlu0 %1435, %v656_v35   ;;  %v659_v35 = vsel %vm643_vm15, 1, %v2634_v11  ;;  %v759_v3 = vsel %vm743_vm11, 1, %v2634_v11  ;;  %vm265_vm15 = vcmp.eq.s32.totalorder %v1766_v43, 1  ;;  %vm268_vm11 = vcmp.eq.s32.totalorder %v1776_v48, 1 }
  0xfb   :  { %v471_v41 = vpop.permute.xlu2 %470  ;;  %v441_v44 = vpop.permute.xlu1 %440 }
  0xfc   :  { %vm495_vm13 = vcmp.eq.s32.totalorder %v471_v41, 1  ;;  %vm485_vm14 = vcmp.eq.s32.totalorder %v441_v44, 1  ;;  %v438_v61 = vpop.permute.xlu0 %437 }
  0xfd   :  { %v1962_v57 = vsel %vm495_vm13, %v1886_v16, %v399_v6  ;;  %v502_v17 = vsel %vm485_vm14, %v1886_v16, %v389_v45  ;;  %vm484_vm0 = vcmp.eq.s32.totalorder %v438_v61, 1  ;;  %vm152_vm13 = vcmp.eq.s32.totalorder %v1740_v29, 1 }
  0xfe   :  { %v1966_v33 = vsel %vm484_vm0, %v1886_v16, %v388_v63  ;;  %vm151_vm14 = vcmp.eq.s32.totalorder %v1746_v32, 1  ;;  %vm264_vm0 = vcmp.eq.s32.totalorder %v1802_v4, 1  ;;  %v169_v45 = vsel %vm152_vm13, %v1848_v23, 0.0 }
  0xff   :  { %v168_v41 = vsel %vm151_vm14, %v1848_v23, 0.0  ;;  %v282_v29 = vsel %vm265_vm15, %v1851_v34, %v169_v45  ;;  %vm381_vm13 = vcmp.eq.s32.totalorder %v1909_v0, 1  ;;  %vm380_vm14 = vcmp.eq.s32.totalorder %v1834_v52, 1  ;;  %v2637_v45 = vld [vmem:[#allocation10_spill] sm:$0xff] }
 0x100   :  { %v281_v32 = vsel %vm264_vm0, %v1851_v34, %v168_v41  ;;  %v395_v58 = vsel %vm378_vm1, %v1855_v39, %v282_v29  ;;  %vm751_vm15 = vcmp.eq.s32.totalorder %v1585_v13, 6  ;;  %vm750_vm0 = vcmp.eq.s32.totalorder %v1590_v14, 6 }
 0x101   :  { %708 = vperm.xlu2 %1437, %v661_v62   ;;  %705 = vperm.xlu1 %1436, %v660_v12   ;;  %v394_v40 = vsel %vm377_vm2, %v1855_v39, %v281_v32  ;;  %v767_v13 = vsel %vm751_vm15, 1, %v2634_v11  ;;  %v766_v14 = vsel %vm750_vm0, 1, %v2634_v11  ;;  %vm756_vm15 = vcmp.eq.s32.totalorder %v1632_v26, 6 }
 0x102   :  { %702 = vperm.xlu0 %1435, %v659_v35   ;;  %v772_v26 = vsel %vm756_vm15, 1, %v2634_v11 }
 0x103   :  { %v480_v46 = vpop.permute.xlu2 %479  ;;  %v450_v5 = vpop.permute.xlu1 %449 }
 0x104   :  { %vm498_vm9 = vcmp.eq.s32.totalorder %v480_v46, 1  ;;  %vm488_vm10 = vcmp.eq.s32.totalorder %v450_v5, 1  ;;  %v447_v56 = vpop.permute.xlu0 %446 }
 0x105   :  { %v1988_v51 = vsel %vm498_vm9, %v1886_v16, %v1936_v54  ;;  %v505_v30 = vsel %vm488_vm10, %v1886_v16, %v392_v37  ;;  %vm487_vm12 = vcmp.eq.s32.totalorder %v447_v56, 1  ;;  %v2003_v54 = vperm.slane %v1841_v60, 4 }
 0x106   :  { %v1992_v2 = vsel %vm487_vm12, %v1886_v16, %v391_v24  ;;  %vm155_vm9 = vcmp.eq.s32.totalorder %v1752_v36, 1  ;;  %vm154_vm10 = vcmp.eq.s32.totalorder %v1758_v38, 1  ;;  %vm267_vm12 = vcmp.eq.s32.totalorder %v1814_v28, 1 }
 0x107   :  { %v171_v62 = vsel %vm154_vm10, %v1848_v23, 0.0 }
 0x108   :  { %v284_v38 = vsel %vm267_vm12, %v1851_v34, %v171_v62  ;;  %vm752_vm12 = vcmp.eq.s32.totalorder %v1616_v21, 6  ;;  %v2128_v62 = vld [vmem:[%s2625_s0 + $0x10] sm:$0xff] }
 0x109   :  { %782 = vperm.xlu2 %1437, %v761_v9   ;;  %779 = vperm.xlu1 %1436, %v760_v49   ;;  %v397_v28 = vsel %vm380_vm14, %v1855_v39, %v284_v38  ;;  %vm757_vm14 = vcmp.eq.s32.totalorder %v1627_v25, 6 }
 0x10a   :  { %776 = vperm.xlu0 %1435, %v759_v3   ;;  %v773_v25 = vsel %vm757_vm14, 1, %v2634_v11  ;;  %vm858_vm14 = vcmp.eq.s32.totalorder %v2128_v62, 7 }
 0x10b   :  { %v554_v43 = vpop.permute.xlu2 %553  ;;  %v459_v4 = vpop.permute.xlu1 %458 }
 0x10c   :  { %vm598_vm5 = vcmp.eq.s32.totalorder %v554_v43, 1  ;;  %vm491_vm6 = vcmp.eq.s32.totalorder %v459_v4, 1  ;;  %v456_v44 = vpop.permute.xlu0 %455 }
 0x10d   :  { %v2016_v6 = vsel %vm598_vm5, %v2003_v54, %v502_v17  ;;  %v508_v61 = vsel %vm491_vm6, %v1886_v16, %v395_v58  ;;  %vm490_vm8 = vcmp.eq.s32.totalorder %v456_v44, 1  ;;  %v172_v17 = vsel %vm155_vm9, %v1848_v23, 0.0 }
 0x10e   :  { %v2020_v63 = vsel %vm490_vm8, %v1886_v16, %v394_v40  ;;  %v285_v36 = vsel %vm268_vm11, %v1851_v34, %v172_v17  ;;  %vm158_vm5 = vcmp.eq.s32.totalorder %v1764_v42, 1  ;;  %vm271_vm6 = vcmp.eq.s32.totalorder %v2635_v15, 1 }
 0x10f   :  { %v398_v0 = vsel %vm381_vm13, %v1855_v39, %v285_v36  ;;  %v175_v18 = vsel %vm158_vm5, %v1848_v23, 0.0  ;;  %vm754_vm8 = vcmp.eq.s32.totalorder %v1606_v19, 6  ;;  %vm753_vm9 = vcmp.eq.s32.totalorder %v1611_v20, 6 }
 0x110   :  { %v288_v46 = vsel %vm271_vm6, %v1851_v34, %v175_v18  ;;  %v2636_v34 = vld [vmem:[#allocation9_spill] sm:$0xff]  ;;  %v770_v19 = vsel %vm754_vm8, 1, %v2634_v11  ;;  %v769_v20 = vsel %vm753_vm9, 1, %v2634_v11  ;;  %vm758_vm8 = vcmp.eq.s32.totalorder %v1648_v31, 6 }
 0x111   :  { %791 = vperm.xlu2 %1437, %v764_v1   ;;  %788 = vperm.xlu1 %1436, %v763_v7   ;;  %v401_v42 = vsel %vm384_vm7, %v1855_v39, %v288_v46  ;;  %v768_v39 = vsel %vm752_vm12, 1, %v2634_v11  ;;  %v774_v1 = vsel %vm758_vm8, 1, %v2634_v11  ;;  %v2111_v31 = vperm.slane %v1841_v60, 5 }
 0x112   :  { %785 = vperm.xlu0 %1435, %v762_v8  }
 0x113   :  { %v563_v12 = vpop.permute.xlu2 %562  ;;  %v468_v35 = vpop.permute.xlu1 %467 }
 0x114   :  { %vm601_vm1 = vcmp.eq.s32.totalorder %v563_v12, 1  ;;  %vm494_vm2 = vcmp.eq.s32.totalorder %v468_v35, 1  ;;  %v465_v48 = vpop.permute.xlu0 %464 }
 0x115   :  { %v2041_v52 = vsel %vm601_vm1, %v2003_v54, %v505_v30  ;;  %v511_v10 = vsel %vm494_vm2, %v1886_v16, %v398_v0  ;;  %vm493_vm4 = vcmp.eq.s32.totalorder %v465_v48, 1  ;;  %vm755_vm2 = vcmp.eq.s32.totalorder %v1637_v27, 6 }
 0x116   :  { %v2045_v22 = vsel %vm493_vm4, %v1886_v16, %v397_v28  ;;  %v771_v29 = vsel %vm755_vm2, 1, %v2634_v11  ;;  %v874_v48 = vsel %vm858_vm14, 1, %v2634_v11 }
 0x119   :  { %800 = vperm.xlu2 %1437, %v767_v13   ;;  %797 = vperm.xlu1 %1436, %v766_v14   ;;  %v2158_v14 = vld [vmem:[%s2625_s0 + $0x28] sm:$0xff] }
 0x11a   :  { %794 = vperm.xlu0 %1435, %v765_v53  }
 0x11b   :  { %v572_v5 = vpop.permute.xlu2 %571  ;;  %v477_v37 = vpop.permute.xlu1 %476 }
 0x11c   :  { %vm604_vm10 = vcmp.eq.s32.totalorder %v572_v5, 1  ;;  %vm497_vm11 = vcmp.eq.s32.totalorder %v477_v37, 1  ;;  %v474_v56 = vpop.permute.xlu0 %473 }
 0x11d   :  { %v2060_v59 = vsel %vm604_vm10, %v2003_v54, %v508_v61  ;;  %v514_v23 = vsel %vm497_vm11, %v1886_v16, %v401_v42  ;;  %vm496_vm13 = vcmp.eq.s32.totalorder %v474_v56, 1 }
 0x11e   :  { %v2065_v24 = vsel %vm496_vm13, %v1886_v16, %v2636_v34  ;;  %v2188_v34 = vld [vmem:[%s2625_s0 + $0x40] sm:$0xff] }
 0x121   :  { %809 = vperm.xlu2 %1437, %v770_v19   ;;  %806 = vperm.xlu1 %1436, %v769_v20  }
 0x122   :  { %803 = vperm.xlu0 %1435, %v768_v39  }
 0x123   :  { %v581_v21 = vpop.permute.xlu2 %580  ;;  %v551_v30 = vpop.permute.xlu1 %550 }
 0x124   :  { %vm607_vm0 = vcmp.eq.s32.totalorder %v581_v21, 1  ;;  %vm597_vm1 = vcmp.eq.s32.totalorder %v551_v30, 1  ;;  %v483_v9 = vpop.permute.xlu0 %482 }
 0x125   :  { %v2074_v49 = vsel %vm607_vm0, %v2003_v54, %v511_v10  ;;  %v614_v3 = vsel %vm597_vm1, %v2003_v54, %v1966_v33  ;;  %vm499_vm3 = vcmp.eq.s32.totalorder %v483_v9, 1  ;;  %v2088_v33 = vld [vmem:[%s2625_s0 + $0x8] sm:$0xff] }
 0x126   :  { %v2080_v41 = vsel %vm499_vm3, %v1886_v16, %v2637_v45  ;;  %vm857_vm4 = vcmp.eq.s32.totalorder %v2088_v33, 7  ;;  %v2094_v16 = vld [vmem:[%s2625_s0] sm:$0xff] }
 0x127   :  { %vm856_vm5 = vcmp.eq.s32.totalorder %v2094_v16, 7  ;;  %v873_v40 = vsel %vm857_vm4, 1, %v2634_v11  ;;  %vm861_vm4 = vcmp.eq.s32.totalorder %v2158_v14, 7 }
 0x128   :  { %v872_v61 = vsel %vm856_vm5, 1, %v2634_v11  ;;  %v877_v37 = vsel %vm861_vm4, 1, %v2634_v11 }
 0x129   :  { %818 = vperm.xlu2 %1437, %v773_v25   ;;  %815 = vperm.xlu1 %1436, %v772_v26   ;;  %v2218_v26 = vld [vmem:[%s2625_s0 + $0x58] sm:$0xff] }
 0x12a   :  { %812 = vperm.xlu0 %1435, %v771_v29  }
 0x12b   :  { %v590_v27 = vpop.permute.xlu2 %589  ;;  %v560_v32 = vpop.permute.xlu1 %559 }
 0x12c   :  { %vm610_vm6 = vcmp.eq.s32.totalorder %v590_v27, 1  ;;  %vm600_vm7 = vcmp.eq.s32.totalorder %v560_v32, 1  ;;  %v557_v43 = vpop.permute.xlu0 %556 }
 0x12d   :  { %v2099_v4 = vsel %vm610_vm6, %v2003_v54, %v514_v23  ;;  %v617_v58 = vsel %vm600_vm7, %v2003_v54, %v1992_v2  ;;  %vm599_vm9 = vcmp.eq.s32.totalorder %v557_v43, 1  ;;  %v2116_v2 = vld [vmem:[%s2625_s0 + $0x20] sm:$0xff] }
 0x12e   :  { %v2105_v44 = vsel %vm599_vm9, %v2003_v54, %v1897_v47  ;;  %vm860_vm10 = vcmp.eq.s32.totalorder %v2116_v2, 7  ;;  %v2122_v47 = vld [vmem:[%s2625_s0 + $0x18] sm:$0xff] }
 0x12f   :  { %vm859_vm11 = vcmp.eq.s32.totalorder %v2122_v47, 7  ;;  %v876_v35 = vsel %vm860_vm10, 1, %v2634_v11  ;;  %vm864_vm10 = vcmp.eq.s32.totalorder %v2188_v34, 7 }
 0x130   :  { %v875_v0 = vsel %vm859_vm11, 1, %v2634_v11  ;;  %v880_v9 = vsel %vm864_vm10, 1, %v2634_v11 }
 0x131   :  { %892 = vperm.xlu2 %1437, %v873_v40   ;;  %889 = vperm.xlu1 %1436, %v872_v61  }
 0x132   :  { %821 = vperm.xlu0 %1435, %v774_v1  }
 0x133   :  { %v664_v7 = vpop.permute.xlu2 %663  ;;  %v569_v8 = vpop.permute.xlu1 %568 }
 0x134   :  { %vm710_vm12 = vcmp.eq.s32.totalorder %v664_v7, 1  ;;  %vm603_vm13 = vcmp.eq.s32.totalorder %v569_v8, 1  ;;  %v566_v17 = vpop.permute.xlu0 %565 }
 0x135   :  { %v2132_v36 = vsel %vm710_vm12, %v2111_v31, %v614_v3  ;;  %v620_v38 = vsel %vm603_vm13, %v2003_v54, %v2020_v63  ;;  %vm602_vm15 = vcmp.eq.s32.totalorder %v566_v17, 1  ;;  %v2146_v63 = vld [vmem:[%s2625_s0 + $0x38] sm:$0xff] }
 0x136   :  { %v2138_v12 = vsel %vm602_vm15, %v2003_v54, %v1913_v55  ;;  %vm863_vm0 = vcmp.eq.s32.totalorder %v2146_v63, 7  ;;  %v2152_v55 = vld [vmem:[%s2625_s0 + $0x30] sm:$0xff] }
 0x137   :  { %vm862_vm1 = vcmp.eq.s32.totalorder %v2152_v55, 7  ;;  %v879_v46 = vsel %vm863_vm0, 1, %v2634_v11  ;;  %vm867_vm0 = vcmp.eq.s32.totalorder %v2218_v26, 7 }
 0x138   :  { %v878_v5 = vsel %vm862_vm1, 1, %v2634_v11  ;;  %v883_v40 = vsel %vm867_vm0, 1, %v2634_v11 }
 0x139   :  { %901 = vperm.xlu2 %1437, %v876_v35   ;;  %898 = vperm.xlu1 %1436, %v875_v0  }
 0x13a   :  { %895 = vperm.xlu0 %1435, %v874_v48  }
 0x13b   :  { %v673_v28 = vpop.permute.xlu2 %672  ;;  %v578_v10 = vpop.permute.xlu1 %577 }
 0x13c   :  { %vm713_vm2 = vcmp.eq.s32.totalorder %v673_v28, 1  ;;  %vm606_vm3 = vcmp.eq.s32.totalorder %v578_v10, 1  ;;  %v575_v13 = vpop.permute.xlu0 %574 }
 0x13d   :  { %v2162_v53 = vsel %vm713_vm2, %v2111_v31, %v617_v58  ;;  %v623_v15 = vsel %vm606_vm3, %v2003_v54, %v2045_v22  ;;  %vm605_vm5 = vcmp.eq.s32.totalorder %v575_v13, 1  ;;  %v2176_v22 = vld [vmem:[%s2625_s0 + $0x50] sm:$0xff]  ;;  %vm969_vm2 = vcmp.eq.s32.totalorder %v2094_v16, 8 }
 0x13e   :  { %v2168_v18 = vsel %vm605_vm5, %v2003_v54, %v1933_v50  ;;  %vm866_vm6 = vcmp.eq.s32.totalorder %v2176_v22, 7  ;;  %v2182_v50 = vld [vmem:[%s2625_s0 + $0x48] sm:$0xff] }
 0x13f   :  { %vm865_vm7 = vcmp.eq.s32.totalorder %v2182_v50, 7  ;;  %v882_v21 = vsel %vm866_vm6, 1, %v2634_v11 }
 0x140   :  { %v881_v30 = vsel %vm865_vm7, 1, %v2634_v11 }
 0x141   :  { %910 = vperm.xlu2 %1437, %v879_v46   ;;  %907 = vperm.xlu1 %1436, %v878_v5  }
 0x142   :  { %904 = vperm.xlu0 %1435, %v877_v37   ;;  %v2274_v37 = vperm.slane %v1841_v60, 6 }
 0x143   :  { %v682_v42 = vpop.permute.xlu2 %681  ;;  %v587_v56 = vpop.permute.xlu1 %586 }
 0x144   :  { %vm716_vm8 = vcmp.eq.s32.totalorder %v682_v42, 1  ;;  %vm609_vm9 = vcmp.eq.s32.totalorder %v587_v56, 1  ;;  %v584_v23 = vpop.permute.xlu0 %583 }
 0x145   :  { %v2192_v19 = vsel %vm716_vm8, %v2111_v31, %v620_v38  ;;  %v626_v20 = vsel %vm609_vm9, %v2003_v54, %v2065_v24  ;;  %vm608_vm11 = vcmp.eq.s32.totalorder %v584_v23, 1  ;;  %v2206_v24 = vld [vmem:[%s2625_s0 + $0x68] sm:$0xff]  ;;  %v985_v38 = vsel %vm969_vm2, 1, %v2634_v11 }
 0x146   :  { %v2198_v39 = vsel %vm608_vm11, %v2003_v54, %v1962_v57  ;;  %vm869_vm12 = vcmp.eq.s32.totalorder %v2206_v24, 7  ;;  %v2212_v57 = vld [vmem:[%s2625_s0 + $0x60] sm:$0xff]  ;;  %vm972_vm8 = vcmp.eq.s32.totalorder %v2122_v47, 8  ;;  %vm971_vm9 = vcmp.eq.s32.totalorder %v2128_v62, 8 }
 0x147   :  { %vm868_vm13 = vcmp.eq.s32.totalorder %v2212_v57, 7  ;;  %v885_v43 = vsel %vm869_vm12, 1, %v2634_v11  ;;  %vm970_vm12 = vcmp.eq.s32.totalorder %v2088_v33, 8  ;;  %v987_v46 = vsel %vm971_vm9, 1, %v2634_v11 }
 0x148   :  { %v884_v58 = vsel %vm868_vm13, 1, %v2634_v11  ;;  %v986_v5 = vsel %vm970_vm12, 1, %v2634_v11  ;;  %vm973_vm2 = vcmp.eq.s32.totalorder %v2116_v2, 8 }
 0x149   :  { %919 = vperm.xlu2 %1437, %v882_v21   ;;  %916 = vperm.xlu1 %1436, %v881_v30  }
 0x14a   :  { %913 = vperm.xlu0 %1435, %v880_v9   ;;  %v989_v9 = vsel %vm973_vm2, 1, %v2634_v11 }
 0x14b   :  { %v691_v3 = vpop.permute.xlu2 %690  ;;  %v596_v45 = vpop.permute.xlu1 %595 }
 0x14c   :  { %vm719_vm14 = vcmp.eq.s32.totalorder %v691_v3, 1  ;;  %vm612_vm15 = vcmp.eq.s32.totalorder %v596_v45, 1  ;;  %v593_v25 = vpop.permute.xlu0 %592 }
 0x14d   :  { %v2222_v29 = vsel %vm719_vm14, %v2111_v31, %v623_v15  ;;  %v629_v27 = vsel %vm612_vm15, %v2003_v54, %v2080_v41  ;;  %vm611_vm1 = vcmp.eq.s32.totalorder %v593_v25, 1  ;;  %v2237_v41 = vld [vmem:[%s2625_s0 + $0x78] sm:$0xff]  ;;  %v988_v15 = vsel %vm972_vm8, 1, %v2634_v11 }
 0x14e   :  { %v2228_v32 = vsel %vm611_vm1, %v2003_v54, %v1988_v51  ;;  %vm871_vm3 = vcmp.eq.s32.totalorder %v2237_v41, 7  ;;  %v2243_v54 = vld [vmem:[%s2625_s0 + $0x70] sm:$0xff]  ;;  %vm975_vm14 = vcmp.eq.s32.totalorder %v2152_v55, 8  ;;  %vm974_vm15 = vcmp.eq.s32.totalorder %v2158_v14, 8 }
 0x14f   :  { %vm870_vm6 = vcmp.eq.s32.totalorder %v2243_v54, 7  ;;  %v887_v35 = vsel %vm871_vm3, 1, %v2634_v11  ;;  %v991_v21 = vsel %vm975_vm14, 1, %v2634_v11  ;;  %v990_v30 = vsel %vm974_vm15, 1, %v2634_v11 }
 0x150   :  { %v886_v0 = vsel %vm870_vm6, 1, %v2634_v11  ;;  %vm976_vm8 = vcmp.eq.s32.totalorder %v2146_v63, 8  ;;  %vm979_vm14 = vcmp.eq.s32.totalorder %v2176_v22, 8 }
 0x151   :  { %928 = vperm.xlu2 %1437, %v885_v43   ;;  %925 = vperm.xlu1 %1436, %v884_v58  }
 0x152   :  { %922 = vperm.xlu0 %1435, %v883_v40   ;;  %v992_v40 = vsel %vm976_vm8, 1, %v2634_v11 }
 0x153   :  { %v700_v61 = vpop.permute.xlu2 %699  ;;  %v670_v1 = vpop.permute.xlu1 %669 }
 0x154   :  { %vm722_vm4 = vcmp.eq.s32.totalorder %v700_v61, 1  ;;  %vm712_vm5 = vcmp.eq.s32.totalorder %v670_v1, 1  ;;  %v667_v51 = vpop.permute.xlu0 %666 }
 0x155   :  { %v2247_v7 = vsel %vm722_vm4, %v2111_v31, %v626_v20  ;;  %v729_v8 = vsel %vm712_vm5, %v2111_v31, %v2105_v44  ;;  %vm711_vm7 = vcmp.eq.s32.totalorder %v667_v51, 1  ;;  %vm978_vm4 = vcmp.eq.s32.totalorder %v2182_v50, 8 }
 0x156   :  { %v2253_v17 = vsel %vm711_vm7, %v2111_v31, %v2016_v6  ;;  %vm977_vm5 = vcmp.eq.s32.totalorder %v2188_v34, 8  ;;  %v994_v43 = vsel %vm978_vm4, 1, %v2634_v11  ;;  %vm982_vm4 = vcmp.eq.s32.totalorder %v2206_v24, 8 }
 0x157   :  { %v993_v58 = vsel %vm977_vm5, 1, %v2634_v11 }
 0x159   :  { %1002 = vperm.xlu2 %1437, %v985_v38   ;;  %934 = vperm.xlu1 %1436, %v887_v35  }
 0x15a   :  { %931 = vperm.xlu0 %1435, %v886_v0   ;;  %v995_v0 = vsel %vm979_vm14, 1, %v2634_v11 }
 0x15b   :  { %v709_v48 = vpop.permute.xlu2 %708  ;;  %v679_v28 = vpop.permute.xlu1 %678 }
 0x15c   :  { %vm725_vm10 = vcmp.eq.s32.totalorder %v709_v48, 1  ;;  %vm715_vm11 = vcmp.eq.s32.totalorder %v679_v28, 1  ;;  %v676_v44 = vpop.permute.xlu0 %675 }
 0x15d   :  { %v2262_v6 = vsel %vm725_vm10, %v2111_v31, %v629_v27  ;;  %v732_v10 = vsel %vm715_vm11, %v2111_v31, %v2138_v12  ;;  %vm714_vm13 = vcmp.eq.s32.totalorder %v676_v44, 1  ;;  %vm981_vm10 = vcmp.eq.s32.totalorder %v2212_v57, 8 }
 0x15e   :  { %v2268_v13 = vsel %vm714_vm13, %v2111_v31, %v2041_v52  ;;  %vm980_vm11 = vcmp.eq.s32.totalorder %v2218_v26, 8  ;;  %v997_v38 = vsel %vm981_vm10, 1, %v2634_v11  ;;  %vm1082_vm10 = vcmp.eq.s32.totalorder %v2094_v16, 9 }
 0x15f   :  { %v996_v35 = vsel %vm980_vm11, 1, %v2634_v11  ;;  %v2352_v16 = vperm.slane %v1841_v60, 7 }
 0x161   :  { %1011 = vperm.xlu2 %1437, %v988_v15   ;;  %1008 = vperm.xlu1 %1436, %v987_v46   ;;  %v998_v46 = vsel %vm982_vm4, 1, %v2634_v11 }
 0x162   :  { %1005 = vperm.xlu0 %1435, %v986_v5  }
 0x163   :  { %v783_v42 = vpop.permute.xlu2 %782  ;;  %v688_v56 = vpop.permute.xlu1 %687 }
 0x164   :  { %vm825_vm0 = vcmp.eq.s32.totalorder %v783_v42, 1  ;;  %vm718_vm1 = vcmp.eq.s32.totalorder %v688_v56, 1  ;;  %v685_v52 = vpop.permute.xlu0 %684 }
 0x165   :  { %v2280_v12 = vsel %vm825_vm0, %v2274_v37, %v729_v8  ;;  %v735_v23 = vsel %vm718_vm1, %v2111_v31, %v2168_v18  ;;  %vm717_vm3 = vcmp.eq.s32.totalorder %v685_v52, 1  ;;  %vm984_vm0 = vcmp.eq.s32.totalorder %v2237_v41, 8 }
 0x166   :  { %v2286_v20 = vsel %vm717_vm3, %v2111_v31, %v2060_v59  ;;  %vm983_vm1 = vcmp.eq.s32.totalorder %v2243_v54, 8 }
 0x167   :  { %v999_v15 = vsel %vm983_vm1, 1, %v2634_v11 }
 0x169   :  { %1020 = vperm.xlu2 %1437, %v991_v21   ;;  %1017 = vperm.xlu1 %1436, %v990_v30  }
 0x16a   :  { %1014 = vperm.xlu0 %1435, %v989_v9  }
 0x16b   :  { %v792_v3 = vpop.permute.xlu2 %791  ;;  %v697_v45 = vpop.permute.xlu1 %696 }
 0x16c   :  { %vm828_vm6 = vcmp.eq.s32.totalorder %v792_v3, 1  ;;  %vm721_vm7 = vcmp.eq.s32.totalorder %v697_v45, 1  ;;  %v694_v18 = vpop.permute.xlu0 %693 }
 0x16d   :  { %v2295_v59 = vsel %vm828_vm6, %v2274_v37, %v732_v10  ;;  %v738_v25 = vsel %vm721_vm7, %v2111_v31, %v2198_v39  ;;  %vm720_vm9 = vcmp.eq.s32.totalorder %v694_v18, 1  ;;  %v1000_v10 = vsel %vm984_vm0, 1, %v2634_v11 }
 0x16e   :  { %v2301_v27 = vsel %vm720_vm9, %v2111_v31, %v2074_v49  ;;  %vm1084_vm6 = vcmp.eq.s32.totalorder %v2128_v62, 9  ;;  %vm1083_vm7 = vcmp.eq.s32.totalorder %v2088_v33, 9  ;;  %vm1085_vm0 = vcmp.eq.s32.totalorder %v2122_v47, 9 }
 0x16f   :  { %v1100_v62 = vsel %vm1084_vm6, 1, %v2634_v11  ;;  %v1099_v33 = vsel %vm1083_vm7, 1, %v2634_v11  ;;  %v1101_v3 = vsel %vm1085_vm0, 1, %v2634_v11  ;;  %vm1088_vm6 = vcmp.eq.s32.totalorder %v2152_v55, 9 }
 0x171   :  { %1029 = vperm.xlu2 %1437, %v994_v43   ;;  %1026 = vperm.xlu1 %1436, %v993_v58   ;;  %v1104_v43 = vsel %vm1088_vm6, 1, %v2634_v11  ;;  %vm1097_vm6 = vcmp.eq.s32.totalorder %v2237_v41, 9 }
 0x172   :  { %1023 = vperm.xlu0 %1435, %v992_v40  }
 0x173   :  { %v801_v61 = vpop.permute.xlu2 %800  ;;  %v706_v1 = vpop.permute.xlu1 %705 }
 0x174   :  { %vm831_vm12 = vcmp.eq.s32.totalorder %v801_v61, 1  ;;  %vm724_vm13 = vcmp.eq.s32.totalorder %v706_v1, 1  ;;  %v703_v39 = vpop.permute.xlu0 %702 }
 0x175   :  { %v2310_v49 = vsel %vm831_vm12, %v2274_v37, %v735_v23  ;;  %v741_v51 = vsel %vm724_vm13, %v2111_v31, %v2228_v32  ;;  %vm723_vm15 = vcmp.eq.s32.totalorder %v703_v39, 1  ;;  %v1098_v23 = vsel %vm1082_vm10, 1, %v2634_v11 }
 0x176   :  { %v2316_v8 = vsel %vm723_vm15, %v2111_v31, %v2099_v4  ;;  %vm1087_vm12 = vcmp.eq.s32.totalorder %v2158_v14, 9  ;;  %vm1086_vm13 = vcmp.eq.s32.totalorder %v2116_v2, 9 }
 0x177   :  { %v1103_v14 = vsel %vm1087_vm12, 1, %v2634_v11  ;;  %v1102_v2 = vsel %vm1086_vm13, 1, %v2634_v11  ;;  %vm1091_vm12 = vcmp.eq.s32.totalorder %v2182_v50, 9 }
 0x179   :  { %1038 = vperm.xlu2 %1437, %v997_v38   ;;  %1035 = vperm.xlu1 %1436, %v996_v35  }
 0x17a   :  { %1032 = vperm.xlu0 %1435, %v995_v0  }
 0x17b   :  { %v810_v48 = vpop.permute.xlu2 %809  ;;  %v780_v28 = vpop.permute.xlu1 %779 }
 0x17c   :  { %vm834_vm2 = vcmp.eq.s32.totalorder %v810_v48, 1  ;;  %vm824_vm3 = vcmp.eq.s32.totalorder %v780_v28, 1  ;;  %v777_v32 = vpop.permute.xlu0 %776 }
 0x17d   :  { %v2325_v4 = vsel %vm834_vm2, %v2274_v37, %v738_v25  ;;  %v841_v31 = vsel %vm824_vm3, %v2274_v37, %v2253_v17  ;;  %vm823_vm5 = vcmp.eq.s32.totalorder %v777_v32, 1  ;;  %vm1090_vm2 = vcmp.eq.s32.totalorder %v2188_v34, 9 }
 0x17e   :  { %v2331_v44 = vsel %vm823_vm5, %v2274_v37, %v2132_v36  ;;  %vm1089_vm3 = vcmp.eq.s32.totalorder %v2146_v63, 9  ;;  %v1106_v34 = vsel %vm1090_vm2, 1, %v2634_v11  ;;  %vm1094_vm2 = vcmp.eq.s32.totalorder %v2212_v57, 9 }
 0x17f   :  { %v1105_v63 = vsel %vm1089_vm3, 1, %v2634_v11  ;;  %v1113_v32 = vsel %vm1097_vm6, 1, %v2634_v11 }
 0x181   :  { %1047 = vperm.xlu2 %1437, %v1000_v10   ;;  %1044 = vperm.xlu1 %1436, %v999_v15  }
 0x182   :  { %1041 = vperm.xlu0 %1435, %v998_v46  }
 0x183   :  { %v819_v5 = vpop.permute.xlu2 %818  ;;  %v789_v42 = vpop.permute.xlu1 %788 }
 0x184   :  { %vm837_vm8 = vcmp.eq.s32.totalorder %v819_v5, 1  ;;  %vm827_vm9 = vcmp.eq.s32.totalorder %v789_v42, 1  ;;  %v786_v17 = vpop.permute.xlu0 %785 }
 0x185   :  { %v2340_v36 = vsel %vm837_vm8, %v2274_v37, %v741_v51  ;;  %v844_v56 = vsel %vm827_vm9, %v2274_v37, %v2268_v13  ;;  %vm826_vm11 = vcmp.eq.s32.totalorder %v786_v17, 1  ;;  %vm1093_vm8 = vcmp.eq.s32.totalorder %v2218_v26, 9 }
 0x186   :  { %v2346_v52 = vsel %vm826_vm11, %v2274_v37, %v2162_v53  ;;  %vm1092_vm9 = vcmp.eq.s32.totalorder %v2176_v22, 9  ;;  %v1109_v1 = vsel %vm1093_vm8, 1, %v2634_v11  ;;  %v1107_v22 = vsel %vm1091_vm12, 1, %v2634_v11 }
 0x187   :  { %v1108_v26 = vsel %vm1092_vm9, 1, %v2634_v11 }
 0x189   :  { %1121 = vperm.xlu2 %1437, %v1100_v62   ;;  %1118 = vperm.xlu1 %1436, %v1099_v33  }
 0x18a   :  { %1115 = vperm.xlu0 %1435, %v1098_v23  }
 0x18b   :  { %v893_v21 = vpop.permute.xlu2 %892  ;;  %v798_v30 = vpop.permute.xlu1 %797 }
 0x18c   :  { %vm937_vm14 = vcmp.eq.s32.totalorder %v893_v21, 1  ;;  %vm830_vm15 = vcmp.eq.s32.totalorder %v798_v30, 1  ;;  %v795_v53 = vpop.permute.xlu0 %794 }
 0x18d   :  { %v2358_v13 = vsel %vm937_vm14, %v2352_v16, %v841_v31  ;;  %v847_v9 = vsel %vm830_vm15, %v2274_v37, %v2286_v20  ;;  %vm829_vm1 = vcmp.eq.s32.totalorder %v795_v53, 1  ;;  %vm1096_vm14 = vcmp.eq.s32.totalorder %v2243_v54, 9 }
 0x18e   :  { %v2364_v60 = vsel %vm829_vm1, %v2274_v37, %v2192_v19  ;;  %vm1095_vm15 = vcmp.eq.s32.totalorder %v2206_v24, 9  ;;  %v1112_v35 = vsel %vm1096_vm14, 1, %v2634_v11  ;;  %v1110_v24 = vsel %vm1094_vm2, 1, %v2634_v11 }
 0x18f   :  { %v1111_v54 = vsel %vm1095_vm15, 1, %v2634_v11 }
 0x191   :  { %1130 = vperm.xlu2 %1437, %v1103_v14   ;;  %1127 = vperm.xlu1 %1436, %v1102_v2  }
 0x192   :  { %1124 = vperm.xlu0 %1435, %v1101_v3  }
 0x193   :  { %v902_v47 = vpop.permute.xlu2 %901  ;;  %v807_v45 = vpop.permute.xlu1 %806 }
 0x194   :  { %vm940_vm4 = vcmp.eq.s32.totalorder %v902_v47, 1  ;;  %vm833_vm5 = vcmp.eq.s32.totalorder %v807_v45, 1  ;;  %v804_v20 = vpop.permute.xlu0 %803 }
 0x195   :  { %v2373_v19 = vsel %vm940_vm4, %v2352_v16, %v844_v56  ;;  %v850_v18 = vsel %vm833_vm5, %v2274_v37, %v2301_v27  ;;  %vm832_vm7 = vcmp.eq.s32.totalorder %v804_v20, 1 }
 0x196   :  { %v2379_v25 = vsel %vm832_vm7, %v2274_v37, %v2222_v29 }
 0x199   :  { %1139 = vperm.xlu2 %1437, %v1106_v34   ;;  %1136 = vperm.xlu1 %1436, %v1105_v63  }
 0x19a   :  { %1133 = vperm.xlu0 %1435, %v1104_v43  }
 0x19b   :  { %v911_v55 = vpop.permute.xlu2 %910  ;;  %v816_v58 = vpop.permute.xlu1 %815 }
 0x19c   :  { %vm943_vm10 = vcmp.eq.s32.totalorder %v911_v55, 1  ;;  %vm836_vm11 = vcmp.eq.s32.totalorder %v816_v58, 1  ;;  %v813_v27 = vpop.permute.xlu0 %812  ;;  %v49_v55 = vld [vmem:[%s2626_s1 + $0x10] sm:$0xff] }
 0x19d   :  { %v2388_v29 = vsel %vm943_vm10, %v2352_v16, %v847_v9  ;;  %v853_v40 = vsel %vm836_vm11, %v2274_v37, %v2316_v8  ;;  %vm835_vm13 = vcmp.eq.s32.totalorder %v813_v27, 1 }
 0x19e   :  { %v852_v61 = vsel %vm835_vm13, %v2274_v37, %v2247_v7 }
 0x1a1   :  { %1148 = vperm.xlu2 %1437, %v1109_v1   ;;  %1145 = vperm.xlu1 %1436, %v1108_v26  }
 0x1a2   :  { %1142 = vperm.xlu0 %1435, %v1107_v22  }
 0x1a3   :  { %v920_v50 = vpop.permute.xlu2 %919  ;;  %v890_v39 = vpop.permute.xlu1 %889 }
 0x1a4   :  { %vm946_vm0 = vcmp.eq.s32.totalorder %v920_v50, 1  ;;  %vm936_vm1 = vcmp.eq.s32.totalorder %v890_v39, 1  ;;  %v822_v51 = vpop.permute.xlu0 %821 }
 0x1a5   :  { %v2401_v7 = vsel %vm946_vm0, %v2352_v16, %v850_v18  ;;  %v953_v8 = vsel %vm936_vm1, %v2352_v16, %v2331_v44  ;;  %vm838_vm3 = vcmp.eq.s32.totalorder %v822_v51, 1 }
 0x1a6   :  { %v855_v38 = vsel %vm838_vm3, %v2274_v37, %v2262_v6  ;;  %v64_v37 = vld [vmem:[#allocation2 + $0x8] sm:$0x3] }
 0x1a7   :  { %v2417_v31 = vperm.slane %v64_v37, 0  ;;  %v2459_v43 = vperm.slane %v64_v37, 1 }
 0x1a9   :  { %1157 = vperm.xlu2 %1437, %v1112_v35   ;;  %1154 = vperm.xlu1 %1436, %v1111_v54   ;;  %v48_v54 = vld [vmem:[%s2626_s1 + $0x8] sm:$0xff] }
 0x1aa   :  { %1151 = vperm.xlu0 %1435, %v1110_v24  }
 0x1ab   :  { %v929_v57 = vpop.permute.xlu2 %928  ;;  %v899_v0 = vpop.permute.xlu1 %898 }
 0x1ac   :  { %vm949_vm4 = vcmp.eq.s32.totalorder %v929_v57, 1  ;;  %vm939_vm5 = vcmp.eq.s32.totalorder %v899_v0, 1  ;;  %v896_v48 = vpop.permute.xlu0 %895  ;;  %v47_v0 = vld [vmem:[%s2626_s1] sm:$0xff] }
 0x1ad   :  { %v2412_v28 = vsel %vm949_vm4, %v2352_v16, %v853_v40  ;;  %v956_v6 = vsel %vm939_vm5, %v2352_v16, %v2346_v52  ;;  %vm938_vm5 = vcmp.eq.s32.totalorder %v896_v48, 1 }
 0x1b2   :  { %1160 = vperm.xlu0 %1435, %v1113_v32  }
 0x1b3   :  { %v1003_v44 = vpop.permute.xlu2 %1002  ;;  %v908_v10 = vpop.permute.xlu1 %907 }
 0x1b4   :  { %vm1049_vm7 = vcmp.eq.s32.totalorder %v1003_v44, 1  ;;  %vm942_vm8 = vcmp.eq.s32.totalorder %v908_v10, 1  ;;  %v905_v15 = vpop.permute.xlu0 %904 }
 0x1b5   :  { %v2420_v46 = vsel %vm1049_vm7, %v2417_v31, %v953_v8  ;;  %v959_v41 = vsel %vm942_vm8, %v2352_v16, %v2364_v60  ;;  %vm941_vm9 = vcmp.eq.s32.totalorder %v905_v15, 1  ;;  %vm1259_vm8 = vcmask 261120  }
 0x1b6   :  { %v2426_v5 = vsel %vm941_vm9, %v2352_v16, %v2295_v59 }
 0x1bb   :  { %v1012_v11 = vpop.permute.xlu2 %1011  ;;  %v917_v42 = vpop.permute.xlu1 %916 }
 0x1bc   :  { %vm1052_vm10 = vcmp.eq.s32.totalorder %v1012_v11, 1  ;;  %vm945_vm11 = vcmp.eq.s32.totalorder %v917_v42, 1  ;;  %v914_v17 = vpop.permute.xlu0 %913  ;;  %v51_v42 = vld [vmem:[%s2626_s1 + $0x20] sm:$0xff] }
 0x1bd   :  { %v2429_v56 = vsel %vm1052_vm10, %v2417_v31, %v956_v6  ;;  %v962_v52 = vsel %vm945_vm11, %v2352_v16, %v2379_v25  ;;  %vm944_vm12 = vcmp.eq.s32.totalorder %v914_v17, 1 }
 0x1be   :  { %v2435_v62 = vsel %vm944_vm12, %v2352_v16, %v2310_v49 }
 0x1c3   :  { %v1021_v33 = vpop.permute.xlu2 %1020  ;;  %v926_v23 = vpop.permute.xlu1 %925 }
 0x1c4   :  { %vm1055_vm13 = vcmp.eq.s32.totalorder %v1021_v33, 1  ;;  %vm948_vm14 = vcmp.eq.s32.totalorder %v926_v23, 1  ;;  %v923_v59 = vpop.permute.xlu0 %922  ;;  %v52_v33 = vld [vmem:[%s2626_s1 + $0x28] sm:$0xff] }
 0x1c5   :  { %v2438_v21 = vsel %vm1055_vm13, %v2417_v31, %v959_v41  ;;  %v965_v30 = vsel %vm948_vm14, %v2352_v16, %v852_v61  ;;  %vm947_vm15 = vcmp.eq.s32.totalorder %v923_v59, 1 }
 0x1c6   :  { %v2443_v53 = vsel %vm947_vm15, %v2352_v16, %v2325_v4 }
 0x1cb   :  { %v1030_v9 = vpop.permute.xlu2 %1029  ;;  %v935_v60 = vpop.permute.xlu1 %934 }
 0x1cc   :  { %vm1058_vm0 = vcmp.eq.s32.totalorder %v1030_v9, 1  ;;  %vm951_vm1 = vcmp.eq.s32.totalorder %v935_v60, 1  ;;  %v932_v49 = vpop.permute.xlu0 %931 }
 0x1cd   :  { %v2446_v14 = vsel %vm1058_vm0, %v2417_v31, %v962_v52  ;;  %v968_v2 = vsel %vm951_vm1, %v2352_v16, %v855_v38  ;;  %vm950_vm2 = vcmp.eq.s32.totalorder %v932_v49, 1 }
 0x1ce   :  { %v2451_v3 = vsel %vm950_vm2, %v2352_v16, %v2340_v36  ;;  %v955_v36 = vsel %vm938_vm5, %v2352_v16, %v2280_v12 }
 0x1d3   :  { %v1039_v47 = vpop.permute.xlu2 %1038  ;;  %v1009_v45 = vpop.permute.xlu1 %1008 }
 0x1d4   :  { %vm1061_vm3 = vcmp.eq.s32.totalorder %v1039_v47, 1  ;;  %v1006_v4 = vpop.permute.xlu0 %1005  ;;  %vm1051_vm6 = vcmp.eq.s32.totalorder %v1009_v45, 1 }
 0x1d5   :  { %v2454_v20 = vsel %vm1061_vm3, %v2417_v31, %v965_v30  ;;  %v1068_v40 = vsel %vm1051_vm6, %v2417_v31, %v955_v36  ;;  %vm1050_vm9 = vcmp.eq.s32.totalorder %v1006_v4, 1 }
 0x1d6   :  { %v1067_v57 = vsel %vm1050_vm9, %v2417_v31, %v2358_v13 }
 0x1db   :  { %v1048_v18 = vpop.permute.xlu2 %1047  ;;  %v1018_v25 = vpop.permute.xlu1 %1017 }
 0x1dc   :  { %vm1064_vm4 = vcmp.eq.s32.totalorder %v1048_v18, 1  ;;  %v1015_v34 = vpop.permute.xlu0 %1014  ;;  %vm1054_vm12 = vcmp.eq.s32.totalorder %v1018_v25, 1 }
 0x1dd   :  { %v2457_v63 = vsel %vm1064_vm4, %v2417_v31, %v968_v2  ;;  %vm1053_vm13 = vcmp.eq.s32.totalorder %v1015_v34, 1  ;;  %v1071_v11 = vsel %vm1054_vm12, %v2417_v31, %v2426_v5  ;;  %v50_v5 = vld [vmem:[%s2626_s1 + $0x18] sm:$0xff] }
 0x1e3   :  { %v1122_v58 = vpop.permute.xlu2 %1121  ;;  %v2466_v27 = vpop.permute.xlu1 %1026 }
 0x1e4   :  { %vm1164_vm7 = vcmp.eq.s32.totalorder %v1122_v58, 1  ;;  %v2469_v61 = vpop.permute.xlu0 %1023  ;;  %vm1057_vm1 = vcmp.eq.s32.totalorder %v2466_v27, 1  ;;  %v54_v27 = vld [vmem:[%s2626_s1 + $0x38] sm:$0xff] }
 0x1e5   :  { %v1181_v1 = vsel %vm1164_vm7, %v2459_v43, %v1068_v40  ;;  %vm1056_vm3 = vcmp.eq.s32.totalorder %v2469_v61, 1  ;;  %v1074_v34 = vsel %vm1057_vm1, %v2417_v31, %v2435_v62  ;;  %v53_v62 = vld [vmem:[%s2626_s1 + $0x30] sm:$0xff] }
 0x1e6   :  { %v1197_v26 = vsub.f32 %v49_v55, %v1181_v1  ;;  %v55_v55 = vld [vmem:[%s2626_s1 + $0x40] sm:$0xff]  ;;  %v1073_v61 = vsel %vm1056_vm3, %v2417_v31, %v2388_v29  ;;  %vm1356_vm3 = vcmask 195712  }
 0x1e8   :  { %v1213_v22 = vmul.f32 %v1197_v26, %v1197_v26 }
 0x1ea   :  { %v1229_v50 = vmax.f32 %v1213_v22, 1e-12 }
 0x1eb   :  { %v2472_v39 = vpop.permute.xlu1 %1035  ;;  %v1131_v35 = vpop.permute.xlu2 %1130 }
 0x1ec   :  { %v2474_v12 = vpop.permute.xlu0 %1032  ;;  %v1245_v16 = vmin.f32 %v1229_v50, 1e+12  ;;  %vm1167_vm14 = vcmp.eq.s32.totalorder %v1131_v35, 1  ;;  %vm1060_vm6 = vcmp.eq.s32.totalorder %v2472_v39, 1 }
 0x1ed   :  { %v1184_v23 = vsel %vm1167_vm14, %v2459_v43, %v1071_v11  ;;  %vm1059_vm7 = vcmp.eq.s32.totalorder %v2474_v12, 1  ;;  %v58_v12 = vld [vmem:[%s2626_s1 + $0x58] sm:$0xff] }
 0x1ee   :  { %v1266_v51 = vsel %vm1259_vm8, %v1245_v16, 0.0  ;;  %v1200_v47 = vsub.f32 %v52_v33, %v1184_v23  ;;  %v1076_v39 = vsel %vm1059_vm7, %v2417_v31, %v2401_v7  ;;  %vm1372_vm7 = vcmask 458112  }
 0x1ef   :  { %1267 = vadd.xlane.f32.xlu0 %v1266_v51 }
 0x1f3   :  { %v2477_v8 = vpop.permute.xlu1 %1044  ;;  %v1140_v13 = vpop.permute.xlu2 %1139 }
 0x1f4   :  { %v2479_v38 = vpop.permute.xlu0 %1041  ;;  %vm1170_vm2 = vcmp.eq.s32.totalorder %v1140_v13, 1  ;;  %vm1063_vm12 = vcmp.eq.s32.totalorder %v2477_v8, 1 }
 0x1f5   :  { %v1187_v58 = vsel %vm1170_vm2, %v2459_v43, %v1074_v34 }
 0x1f6   :  { %v1203_v35 = vsub.f32 %v55_v55, %v1187_v58 }
 0x1fb   :  { %v1119_v24 = vpop.permute.xlu1 %1118  ;;  %v1149_v26 = vpop.permute.xlu2 %1148 }
 0x1fc   :  { %vm1163_vm10 = vcmp.eq.s32.totalorder %v1119_v24, 1  ;;  %v1116_v48 = vpop.permute.xlu0 %1115  ;;  %vm1173_vm9 = vcmp.eq.s32.totalorder %v1149_v26, 1 }
 0x1fd   :  { %v1180_v6 = vsel %vm1163_vm10, %v2459_v43, %v1067_v57  ;;  %vm1162_vm11 = vcmp.eq.s32.totalorder %v1116_v48, 1 }
 0x1fe   :  { %v1196_v37 = vsub.f32 %v48_v54, %v1180_v6  ;;  %v1179_v32 = vsel %vm1162_vm11, %v2459_v43, %v2420_v46  ;;  %v1070_v46 = vsel %vm1053_vm13, %v2417_v31, %v2373_v19  ;;  %vm1062_vm13 = vcmp.eq.s32.totalorder %v2479_v38, 1  ;;  %v61_v38 = vld [vmem:[%s2626_s1 + $0x70] sm:$0xff] }
 0x1ff   :  { %v1195_v44 = vsub.f32 %v47_v0, %v1179_v32  ;;  %v1219_v32 = vmul.f32 %v1203_v35, %v1203_v35  ;;  %v1079_v34 = vsel %vm1062_vm13, %v2417_v31, %v2412_v28  ;;  %vm1392_vm13 = vcmask 786112  }
 0x200   :  { %v1212_v10 = vmul.f32 %v1196_v37, %v1196_v37 }
 0x201   :  { %v1211_v15 = vmul.f32 %v1195_v44, %v1195_v44 }
 0x202   :  { %v1228_v41 = vmax.f32 %v1212_v10, 1e-12  ;;  %v57_v10 = vld [vmem:[%s2626_s1 + $0x50] sm:$0xff] }
 0x203   :  { %v1128_v17 = vpop.permute.xlu1 %1127  ;;  %v1227_v52 = vmax.f32 %v1211_v15, 1e-12  ;;  %v1158_v33 = vpop.permute.xlu2 %1157 }
 0x204   :  { %vm1166_vm15 = vcmp.eq.s32.totalorder %v1128_v17, 1  ;;  %v1125_v59 = vpop.permute.xlu0 %1124  ;;  %v1244_v30 = vmin.f32 %v1228_v41, 1e+12  ;;  %vm1176_vm14 = vcmp.eq.s32.totalorder %v1158_v33, 1 }
 0x205   :  { %v1183_v9 = vsel %vm1166_vm15, %v2459_v43, %v1070_v46  ;;  %vm1165_vm0 = vcmp.eq.s32.totalorder %v1125_v59, 1  ;;  %v1243_v60 = vmin.f32 %v1227_v52, 1e+12  ;;  %v1235_v59 = vmax.f32 %v1219_v32, 1e-12 }
 0x206   :  { %v1199_v49 = vsub.f32 %v51_v42, %v1183_v9  ;;  %v1182_v19 = vsel %vm1165_vm0, %v2459_v43, %v2429_v56  ;;  %v1263_v2 = vsel %vm1259_vm8, %v1244_v30, 0.0  ;;  %v1216_v56 = vmul.f32 %v1200_v47, %v1200_v47 }
 0x207   :  { %v1198_v45 = vsub.f32 %v50_v5, %v1182_v19  ;;  %1264 = vadd.xlane.f32.xlu2 %v1263_v2  ;;  %v1260_v4 = vsel %vm1259_vm8, %v1243_v60, 0.0  ;;  %v1251_v47 = vmin.f32 %v1235_v59, 1e+12 }
 0x208   :  { %v1215_v18 = vmul.f32 %v1199_v49, %v1199_v49  ;;  %1261 = vadd.xlane.f32.xlu1 %v1260_v4  ;;  %v1232_v48 = vmax.f32 %v1216_v56, 1e-12 }
 0x209   :  { %v1214_v25 = vmul.f32 %v1198_v45, %v1198_v45  ;;  %v1080_v45 = vsel %vm1063_vm12, %v2417_v31, %v2451_v3  ;;  %v59_v3 = vld [vmem:[%s2626_s1 + $0x60] sm:$0xff]  ;;  %vm1388_vm12 = vcmask 720512  }
 0x20a   :  { %v1231_v36 = vmax.f32 %v1215_v18, 1e-12  ;;  %v1248_v13 = vmin.f32 %v1232_v48, 1e+12  ;;  %v60_v18 = vld [vmem:[%s2626_s1 + $0x68] sm:$0xff] }
 0x20b   :  { %v1137_v40 = vpop.permute.xlu1 %1136  ;;  %v1230_v1 = vmax.f32 %v1214_v25, 1e-12 }
 0x20c   :  { %vm1169_vm4 = vcmp.eq.s32.totalorder %v1137_v40, 1  ;;  %v1134_v22 = vpop.permute.xlu0 %1133  ;;  %v1247_v50 = vmin.f32 %v1231_v36, 1e+12  ;;  %v1275_v60 = vsel %vm1259_vm8, %v1248_v13, 0.0  ;;  %v1193_v36 = vsel %vm1176_vm14, %v2459_v43, %v1080_v45 }
 0x20d   :  { %v1186_v16 = vsel %vm1169_vm4, %v2459_v43, %v1073_v61  ;;  %vm1168_vm5 = vcmp.eq.s32.totalorder %v1134_v22, 1  ;;  %v1246_v51 = vmin.f32 %v1230_v1, 1e+12  ;;  %v1284_v1 = vsel %vm1259_vm8, %v1251_v47, 0.0 }
 0x20e   :  { %v1202_v54 = vsub.f32 %v54_v27, %v1186_v16  ;;  %v1185_v24 = vsel %vm1168_vm5, %v2459_v43, %v2438_v21  ;;  %v1272_v57 = vsel %vm1259_vm8, %v1247_v50, 0.0  ;;  %v1077_v21 = vsel %vm1060_vm6, %v2417_v31, %v2443_v53  ;;  %v56_v53 = vld [vmem:[%s2626_s1 + $0x48] sm:$0xff] }
 0x20f   :  { %v1201_v29 = vsub.f32 %v53_v62, %v1185_v24  ;;  %v1269_v0 = vsel %vm1259_vm8, %v1246_v51, 0.0  ;;  %v1190_v11 = vsel %vm1173_vm9, %v2459_v43, %v1077_v21  ;;  %v1209_v61 = vsub.f32 %v61_v38, %v1193_v36 }
 0x210   :  { %v1218_v6 = vmul.f32 %v1202_v54, %v1202_v54  ;;  %1273 = vadd.xlane.f32.xlu1 %v1272_v57  ;;  %1270 = vadd.xlane.f32.xlu2 %v1269_v0  ;;  %v1206_v30 = vsub.f32 %v58_v12, %v1190_v11  ;;  %vm1360_vm4 = vcmask 261312   ;;  %vm1364_vm5 = vcmask 326912  }
 0x211   :  { %v1217_v37 = vmul.f32 %v1201_v29, %v1201_v29  ;;  %v1225_v35 = vmul.f32 %v1209_v61, %v1209_v61  ;;  %vm1368_vm6 = vcmask 392512   ;;  %vm1376_vm9 = vcmask 523712  }
 0x212   :  { %v1234_v44 = vmax.f32 %v1218_v6, 1e-12  ;;  %v1222_v4 = vmul.f32 %v1206_v30, %v1206_v30  ;;  %vm1396_vm14 = vcmask 851712  }
 0x213   :  { %v1146_v15 = vpop.permute.xlu1 %1145  ;;  %v1233_v41 = vmax.f32 %v1217_v37, 1e-12  ;;  %v1241_v21 = vmax.f32 %v1225_v35, 1e-12 }
 0x214   :  { %vm1172_vm10 = vcmp.eq.s32.totalorder %v1146_v15, 1  ;;  %v1143_v42 = vpop.permute.xlu0 %1142  ;;  %v1250_v17 = vmin.f32 %v1234_v44, 1e+12  ;;  %v1238_v22 = vmax.f32 %v1222_v4, 1e-12 }
 0x215   :  { %v1189_v52 = vsel %vm1172_vm10, %v2459_v43, %v1076_v39  ;;  %vm1171_vm11 = vcmp.eq.s32.totalorder %v1143_v42, 1  ;;  %v1249_v46 = vmin.f32 %v1233_v41, 1e+12  ;;  %v1257_v15 = vmin.f32 %v1241_v21, 1e+12 }
 0x216   :  { %v1205_v23 = vsub.f32 %v57_v10, %v1189_v52  ;;  %v1188_v7 = vsel %vm1171_vm11, %v2459_v43, %v2446_v14  ;;  %v1281_v5 = vsel %vm1259_vm8, %v1250_v17, 0.0  ;;  %v1254_v54 = vmin.f32 %v1238_v22, 1e+12 }
 0x217   :  { %v1204_v9 = vsub.f32 %v56_v53, %v1188_v7  ;;  %v1278_v49 = vsel %vm1259_vm8, %v1249_v46, 0.0  ;;  %v1302_v39 = vsel %vm1259_vm8, %v1257_v15, 0.0  ;;  %v1347_v46 = vlaneseq }
 0x218   :  { %v1221_v19 = vmul.f32 %v1205_v23, %v1205_v23  ;;  %1282 = vadd.xlane.f32.xlu1 %v1281_v5  ;;  %1276 = vadd.xlane.f32.xlu2 %v1275_v60  ;;  %v1293_v32 = vsel %vm1259_vm8, %v1254_v54, 0.0  ;;  %vm1380_vm10 = vcmask 589312   ;;  %vm1384_vm11 = vcmask 654912  }
 0x219   :  { %v1220_v2 = vmul.f32 %v1204_v9, %v1204_v9  ;;  %1279 = vadd.xlane.f32.xlu0 %v1278_v49  ;;  %v2586_v23 = vand.u32 127, %v1347_v46 }
 0x21a   :  { %v1237_v14 = vmax.f32 %v1221_v19, 1e-12 }
 0x21b   :  { %v1155_v25 = vpop.permute.xlu1 %1154  ;;  %v1236_v8 = vmax.f32 %v1220_v2, 1e-12  ;;  %v1350_v5 = vadd.s32 4294967288, %v2586_v23  ;;  %v1354_v45 = vadd.s32 4294967280, %v2586_v23  ;;  %v1366_v36 = vadd.s32 4294967256, %v2586_v23 }
 0x21c   :  { %vm1175_vm15 = vcmp.eq.s32.totalorder %v1155_v25, 1  ;;  %v1152_v56 = vpop.permute.xlu0 %1151  ;;  %v1253_v55 = vmin.f32 %v1237_v14, 1e+12  ;;  %v1358_v14 = vadd.s32 4294967272, %v2586_v23  ;;  %v1378_v22 = vadd.s32 4294967232, %v2586_v23 }
 0x21d   :  { %v1192_v58 = vsel %vm1175_vm15, %v2459_v43, %v1079_v34  ;;  %vm1174_vm0 = vcmp.eq.s32.totalorder %v1152_v56, 1  ;;  %v1252_v27 = vmin.f32 %v1236_v8, 1e+12  ;;  %v1390_v15 = vadd.s32 4294967208, %v2586_v23 }
 0x21e   :  { %v1208_v40 = vsub.f32 %v60_v18, %v1192_v58  ;;  %v1191_v28 = vsel %vm1174_vm0, %v2459_v43, %v2454_v20  ;;  %v1290_v31 = vsel %vm1259_vm8, %v1253_v55, 0.0  ;;  %v62_v20 = vld [vmem:[%s2626_s1 + $0x78] sm:$0xff]  ;;  %v1362_v18 = vadd.s32 4294967264, %v2586_v23  ;;  %s1513_s1 = smov [#allocation5]  }
 0x21f   :  { %v1207_v26 = vsub.f32 %v59_v3, %v1191_v28  ;;  %v1287_v62 = vsel %vm1259_vm8, %v1252_v27, 0.0  ;;  %v1370_v28 = vadd.s32 4294967248, %v2586_v23  ;;  %v1398_v46 = vadd.s32 4294967192, %v2586_v23  ;;  %s1417_s28 = sshll.u32 %s1513_s1, 4  ;;  %s1418_s28 = int_to_ptr.vmem [resolvable:$true] %s1417_s28 }
 0x220   :  { %v1224_v50 = vmul.f32 %v1208_v40, %v1208_v40  ;;  %1291 = vadd.xlane.f32.xlu1 %v1290_v31  ;;  %1285 = vadd.xlane.f32.xlu2 %v1284_v1  ;;  %vm1400_vm15 = vcmask 917312   ;;  %vm1404_vm0 = vcmask 982912  }
 0x221   :  { %v1223_v16 = vmul.f32 %v1207_v26, %v1207_v26  ;;  %1288 = vadd.xlane.f32.xlu0 %v1287_v62 }
 0x222   :  { %v1240_v51 = vmax.f32 %v1224_v50, 1e-12  ;;  %v1374_v50 = vadd.s32 4294967240, %v2586_v23 }
 0x223   :  { %v1239_v24 = vmax.f32 %v1223_v16, 1e-12 }
 0x224   :  { %v1161_v57 = vpop.permute.xlu0 %1160  ;;  %v1256_v29 = vmin.f32 %v1240_v51, 1e+12 }
 0x225   :  { %vm1177_vm1 = vcmp.eq.s32.totalorder %v1161_v57, 1  ;;  %v1255_v0 = vmin.f32 %v1239_v24, 1e+12  ;;  %v1382_v57 = vadd.s32 4294967224, %v2586_v23 }
 0x226   :  { %v1194_v48 = vsel %vm1177_vm1, %v2459_v43, %v2457_v63  ;;  %v1299_v6 = vsel %vm1259_vm8, %v1256_v29, 0.0  ;;  %v1512_v63 = vmov 32.0   ;;  %vm1408_vm1 = vcmask 1048512  }
 0x227   :  { %v1210_v37 = vsub.f32 %v62_v20, %v1194_v48  ;;  %v1296_v44 = vsel %vm1259_vm8, %v1255_v0, 0.0  ;;  %1438 = vrcp.f32 %v1512_v63 }
 0x228   :  { %1300 = vadd.xlane.f32.xlu1 %v1299_v6  ;;  %1294 = vadd.xlane.f32.xlu2 %v1293_v32 }
 0x229   :  { %v1226_v10 = vmul.f32 %v1210_v37, %v1210_v37  ;;  %1297 = vadd.xlane.f32.xlu0 %v1296_v44  ;;  %v1386_v37 = vadd.s32 4294967216, %v2586_v23 }
 0x22b   :  { %v1242_v13 = vmax.f32 %v1226_v10, 1e-12 }
 0x22d   :  { %v1258_v41 = vmin.f32 %v1242_v13, 1e+12  ;;  %v1439_v43 = vpop.eup %1438 }
 0x22e   :  { %v1309_v11 = vmul.f32 32.0, %v1439_v43  ;;  %vm1313_vm2 = vweird.f32 %v1439_v43 }
 0x22f   :  { %v1305_v12 = vsel %vm1259_vm8, %v1258_v41, 0.0  ;;  %vm1352_vm8 = vcmask 130112  }
 0x230   :  { %1303 = vadd.xlane.f32.xlu2 %v1302_v39  ;;  %v1310_v53 = vsub.f32 1.0, %v1309_v11  ;;  %v1394_v39 = vadd.s32 4294967200, %v2586_v23 }
 0x231   :  { %1306 = vadd.xlane.f32.xlu0 %v1305_v12 }
 0x232   :  { %v1311_v42 = vmul.f32 %v1439_v43, %v1310_v53 }
 0x234   :  { %v1312_v33 = vadd.f32 %v1439_v43, %v1311_v42 }
 0x236   :  { %v2588_v7 = vsel %vm1313_vm2, %v1439_v43, %v1312_v33 }
 0x262   :  { %v1268_v49 = vpop.xlane.xlu0 %1267 }
 0x263   :  { %v1317_v4 = vmul.f32 %v2588_v7, %v1268_v49 }
 0x265   :  { %v1355_v56 = vperm.slane %v1317_v4, %v1354_v45 }
 0x27a   :  { %v1265_v17 = vpop.xlane.xlu2 %1264 }
 0x27b   :  { %v1262_v52 = vpop.xlane.xlu1 %1261  ;;  %v1316_v59 = vmul.f32 %v2588_v7, %v1265_v17 }
 0x27c   :  { %v1315_v30 = vmul.f32 %v2588_v7, %v1262_v52 }
 0x27d   :  { %v1351_v19 = vperm.slane %v1316_v59, %v1350_v5  ;;  %v1402_v59 = vadd.s32 4294967184, %v2586_v23 }
 0x27e   :  { %v1349_v2 = vperm.slane %v1315_v30, %v2586_v23 }
 0x280   :  { %v1353_v8 = vsel %vm1352_vm8, %v1351_v19, %v1349_v2 }
 0x281   :  { %v1357_v40 = vsel %vm1356_vm3, %v1355_v56, %v1353_v8 }
 0x283   :  { %v1274_v9 = vpop.xlane.xlu1 %1273  ;;  %v1271_v60 = vpop.xlane.xlu2 %1270 }
 0x284   :  { %v1318_v47 = vmul.f32 %v2588_v7, %v1271_v60  ;;  %v1319_v25 = vmul.f32 %v2588_v7, %v1274_v9  ;;  %v1406_v9 = vadd.s32 4294967176, %v2586_v23 }
 0x286   :  { %v1359_v34 = vperm.slane %v1318_v47, %v1358_v14  ;;  %v1363_v27 = vperm.slane %v1319_v25, %v1362_v18 }
 0x288   :  { %v1361_v1 = vsel %vm1360_vm4, %v1359_v34, %v1357_v40 }
 0x289   :  { %v1365_v26 = vsel %vm1364_vm5, %v1363_v27, %v1361_v1 }
 0x28b   :  { %v1283_v38 = vpop.xlane.xlu1 %1282  ;;  %v1277_v3 = vpop.xlane.xlu2 %1276 }
 0x28c   :  { %v1320_v55 = vmul.f32 %v2588_v7, %v1277_v3  ;;  %v1280_v58 = vpop.xlane.xlu0 %1279  ;;  %v1322_v16 = vmul.f32 %v2588_v7, %v1283_v38 }
 0x28d   :  { %v1321_v31 = vmul.f32 %v2588_v7, %v1280_v58 }
 0x28e   :  { %v1367_v61 = vperm.slane %v1320_v55, %v1366_v36  ;;  %v1375_v6 = vperm.slane %v1322_v16, %v1374_v50 }
 0x28f   :  { %v1371_v62 = vperm.slane %v1321_v31, %v1370_v28 }
 0x290   :  { %v1369_v51 = vsel %vm1368_vm6, %v1367_v61, %v1365_v26 }
 0x291   :  { %v1373_v0 = vsel %vm1372_vm7, %v1371_v62, %v1369_v51 }
 0x292   :  { %v1377_v32 = vsel %vm1376_vm9, %v1375_v6, %v1373_v0 }
 0x293   :  { %v1286_v35 = vpop.xlane.xlu2 %1285  ;;  %v1292_v54 = vpop.xlane.xlu1 %1291 }
 0x294   :  { %v1323_v24 = vmul.f32 %v2588_v7, %v1286_v35  ;;  %v1289_v20 = vpop.xlane.xlu0 %1288  ;;  %v1325_v21 = vmul.f32 %v2588_v7, %v1292_v54 }
 0x295   :  { %v1324_v29 = vmul.f32 %v2588_v7, %v1289_v20 }
 0x296   :  { %v1379_v48 = vperm.slane %v1323_v24, %v1378_v22  ;;  %v1387_v11 = vperm.slane %v1325_v21, %v1386_v37 }
 0x297   :  { %v1383_v44 = vperm.slane %v1324_v29, %v1382_v57 }
 0x298   :  { %v1381_v10 = vsel %vm1380_vm10, %v1379_v48, %v1377_v32 }
 0x299   :  { %v1385_v63 = vsel %vm1384_vm11, %v1383_v44, %v1381_v10 }
 0x29a   :  { %v1389_v17 = vsel %vm1388_vm12, %v1387_v11, %v1385_v63 }
 0x29b   :  { %v1295_v13 = vpop.xlane.xlu2 %1294  ;;  %v1301_v53 = vpop.xlane.xlu1 %1300 }
 0x29c   :  { %v1326_v41 = vmul.f32 %v2588_v7, %v1295_v13  ;;  %v1298_v12 = vpop.xlane.xlu0 %1297  ;;  %v1328_v33 = vmul.f32 %v2588_v7, %v1301_v53 }
 0x29d   :  { %v1327_v43 = vmul.f32 %v2588_v7, %v1298_v12 }
 0x29e   :  { %v1391_v42 = vperm.slane %v1326_v41, %v1390_v15  ;;  %v1399_v2 = vperm.slane %v1328_v33, %v1398_v46 }
 0x29f   :  { %v1395_v52 = vperm.slane %v1327_v43, %v1394_v39 }
 0x2a0   :  { %v1393_v5 = vsel %vm1392_vm13, %v1391_v42, %v1389_v17 }
 0x2a1   :  { %v1397_v60 = vsel %vm1396_vm14, %v1395_v52, %v1393_v5 }
 0x2a2   :  { %v1401_v4 = vsel %vm1400_vm15, %v1399_v2, %v1397_v60 }
 0x2a3   :  { %v1304_v30 = vpop.xlane.xlu2 %1303 }
 0x2a4   :  { %v1329_v49 = vmul.f32 %v2588_v7, %v1304_v30  ;;  %v1307_v19 = vpop.xlane.xlu0 %1306 }
 0x2a5   :  { %v1330_v14 = vmul.f32 %v2588_v7, %v1307_v19 }
 0x2a6   :  { %v1403_v47 = vperm.slane %v1329_v49, %v1402_v59 }
 0x2a7   :  { %v1407_v45 = vperm.slane %v1330_v14, %v1406_v9 }
 0x2a8   :  { %v1405_v23 = vsel %vm1404_vm0, %v1403_v47, %v1401_v4 }
 0x2a9   :  { %v1409_v18 = vsel %vm1408_vm1, %v1407_v45, %v1405_v23 }
 0x2aa   :  { %1411 = vst [vmem:[#allocation5] sm:$0x1] %v1409_v18 }
 0x2ab   :  { %1422 = dma.vmem_to_hbm [thread:$0]  %s1418_s28, 16, %s1420_s4, [#allocation4]  }
 0x2ac   :  { %1506 = dma.done.wait [#allocation4], 16  }
 0x2ad   :  { %1507 = vsyncadd [#allocation4], 4294967280 }
 0x2ae   :  { %1427 = vsyncpa [#allocation3], 1 }
 0x2af   :  { %1428 = vsyncpa [#allocation4], 1 }

</bundles_post_ra>
